<compile_context>
chip_gen: v7x
topology: tpu7x:2x2x1
jax: 0.10.0
libtpu: 0.0.40
codegen_flags: <defaults>
</compile_context>

<pallas_src>
import functools
import math

import jax
import jax.numpy as jnp
from jax.experimental import pallas as pl
from jax.experimental.pallas import tpu as pltpu

EPS = 1e-5

# Hidden widths of the four BN layers (fixed by the architecture) and their
# lane offsets inside the packed gamma/beta array.
_BN_WIDTHS = (128, 256, 512, 512)
_BN_OFFS = (0, 128, 384, 896)
_BN_TOTAL = sum(_BN_WIDTHS)  # 1408


def _vmem_limit(resident_bytes):
    # 2x margin for compiler temporaries / double buffering, 4 MiB slack,
    # 32 MiB floor (safe on every generation), capped at v7x physical 64 MiB.
    return int(min(max(2 * resident_bytes + (4 << 20), 32 << 20), 64 << 20))


def _trunk(z_ref, w1_ref, w2_ref, w3_ref, w4_ref, gb_ref, true_b):
    """First four Linear + training-mode-BN + Sigmoid layers.

    Returns bf16 activations of shape (B_pad, 512).  Rows >= true_b (batch
    padding) are excluded from the BN statistics.
    """
    b_pad = z_ref.shape[0]
    inv_b = 1.0 / float(true_b)
    gb = gb_ref[...]  # (2, 1408): row 0 = gamma, row 1 = beta (f32)

    if true_b != b_pad:
        rows = jax.lax.broadcasted_iota(jnp.int32, (b_pad, 1), 0)
        row_mask = (rows < true_b).astype(jnp.float32)
    else:
        row_mask = None

    def layer(x_bf16, w_ref, off, width):
        # MXU matmul, bf16 operands, f32 accumulation.
        h = jnp.dot(x_bf16, w_ref[...], preferred_element_type=jnp.float32)
        # One-pass batch statistics over the true rows only.
        hm = h if row_mask is None else h * row_mask
        mean = jnp.sum(hm, axis=0, keepdims=True) * inv_b
        ex2 = jnp.sum(hm * hm, axis=0, keepdims=True) * inv_b
        var = jnp.maximum(ex2 - mean * mean, 0.0)  # clamp f32 cancellation
        gamma = gb[0:1, off:off + width]
        beta = gb[1:2, off:off + width]
        # Fused BN affine: h*scale + shift.
        scale = gamma * jax.lax.rsqrt(var + EPS)
        shift = beta - mean * scale
        # EUP-routed sigmoid: 0.5*tanh(0.5*x)+0.5 (single EUP op + 2 VPU ops).
        s = 0.5 * jnp.tanh(0.5 * (h * scale + shift)) + 0.5
        # Keep bf16: next consumer is an MXU dot; halves activation vreg bytes.
        return s.astype(jnp.bfloat16)

    h = layer(z_ref[...].astype(jnp.bfloat16), w1_ref, _BN_OFFS[0], _BN_WIDTHS[0])
    h = layer(h, w2_ref, _BN_OFFS[1], _BN_WIDTHS[1])
    h = layer(h, w3_ref, _BN_OFFS[2], _BN_WIDTHS[2])
    h = layer(h, w4_ref, _BN_OFFS[3], _BN_WIDTHS[3])
    return h


def _decoder_kernel_fused(z_ref, w1_ref, w2_ref, w3_ref, w4_ref, gb_ref,
                          w5_ref, b5_ref, out_ref, *, true_b):
    """Single-shot kernel: everything VMEM-resident, no grid."""
    h = _trunk(z_ref, w1_ref, w2_ref, w3_ref, w4_ref, gb_ref, true_b)
    # Final (lane-dense, zero-padded) projection + bias + ReLU.
    y = jnp.dot(h, w5_ref[...], preferred_element_type=jnp.float32) + b5_ref[...]
    n_rows, n_out = out_ref.shape
    # Store only the true rows / true output columns (no XLA slice afterwards).
    out_ref[...] = jnp.maximum(y, 0.0)[:n_rows, :n_out]


def _decoder_kernel_tiled(z_ref, w1_ref, w2_ref, w3_ref, w4_ref, gb_ref,
                          w5_ref, b5_ref, out_ref, h4_ref, *, true_b):
    """Gridded kernel: final projection tiled over N, trunk computed once."""
    @pl.when(pl.program_id(0) == 0)
    def _():
        h4_ref[...] = _trunk(z_ref, w1_ref, w2_ref, w3_ref, w4_ref, gb_ref,
                             true_b)
    y = jnp.dot(h4_ref[...], w5_ref[...],
                preferred_element_type=jnp.float32) + b5_ref[...]
    out_ref[...] = jnp.maximum(y, 0.0)


def init_params(key, nhid, ncond, signal_len):
    """Deterministic PyTorch-like uniform fan-in init, packed for the kernel.

    Weights are pre-transposed to (in, out) and stored in bf16 (MXU operands).
    Biases of Linear 1-4 are omitted (cancelled by training-mode BN).  The
    final projection (and its bias) is zero-padded to a lane-dense width.
    Returns (w1, w2, w3, w4, gb_packed, w5_pad, b5_pad).
    """
    dims = [nhid + ncond, 128, 256, 512, 512, 4 * signal_len]
    n_out = dims[-1]
    n_pad = max(128, ((n_out + 127) // 128) * 128)

    keys = jax.random.split(key, len(dims) - 1)
    ws = []
    w5 = b5 = None
    for i in range(len(dims) - 1):
        fan_in, fan_out = dims[i], dims[i + 1]
        bound = 1.0 / math.sqrt(fan_in)
        kw, kb = jax.random.split(keys[i])
        w = jax.random.uniform(kw, (fan_in, fan_out), jnp.float32, -bound, bound)
        if i == len(dims) - 2:
            b = jax.random.uniform(kb, (1, fan_out), jnp.float32, -bound, bound)
            w5 = jnp.pad(w, ((0, 0), (0, n_pad - fan_out))).astype(jnp.bfloat16)
            b5 = jnp.pad(b, ((0, 0), (0, n_pad - fan_out)))  # f32
        else:
            ws.append(w.astype(jnp.bfloat16))

    # Packed BN affine params: row 0 = gamma (ones), row 1 = beta (zeros).
    gb = jnp.concatenate([jnp.ones((1, _BN_TOTAL), jnp.float32),
                          jnp.zeros((1, _BN_TOTAL), jnp.float32)], axis=0)

    return (ws[0], ws[1], ws[2], ws[3], gb, w5, b5)


def decoder_forward(z, params, signal_len, *, force_tiled=None):
    w1, w2, w3, w4, gb, w5, b5 = params
    true_b, _ = z.shape
    n_out = 4 * signal_len
    n_pad = w5.shape[1]

    # Pad the batch to a sublane-aligned multiple of 8; padded rows are zero
    # and are excluded from the BN statistics inside the kernel.
    b_pad = max(8, ((true_b + 7) // 8) * 8)
    if b_pad != true_b:
        z = jnp.pad(z, ((0, b_pad - true_b), (0, 0)))

    use_tiled = force_tiled if force_tiled is not None else (n_pad >= 2048)
    vmem = pl.BlockSpec(memory_space=pltpu.MemorySpace.VMEM)

    if not use_tiled:
        resident = sum(int(a.size) * a.dtype.itemsize
                       for a in (z, w1, w2, w3, w4, gb, w5, b5))
        resident += b_pad * n_pad * 4 + true_b * n_out * 4  # widest act + output
        kernel = functools.partial(_decoder_kernel_fused, true_b=true_b)
        out = pl.pallas_call(
            kernel,
            out_shape=jax.ShapeDtypeStruct((true_b, n_out), jnp.float32),
            in_specs=[vmem] * 8,
            out_specs=vmem,
            compiler_params=pltpu.CompilerParams(
                vmem_limit_bytes=_vmem_limit(resident)),
        )(z, w1, w2, w3, w4, gb, w5, b5)
        return out.reshape(true_b, 4, signal_len)

    # ---- Tiled final projection (large 4*signal_len / large B) ----
    tn = 512 if n_pad % 512 == 0 else (256 if n_pad % 256 == 0 else 128)
    grid = (n_pad // tn,)

    resident = 2 * sum(int(a.size) * a.dtype.itemsize
                       for a in (z, w1, w2, w3, w4, gb))
    resident += 2 * (512 * tn * 2 + tn * 4 + b_pad * tn * 4)  # pipelined tiles
    resident += b_pad * 512 * 2                               # h4 scratch

    def _resident_spec(shape):
        return pl.BlockSpec(shape, lambda j, _n=len(shape): (0,) * _n)

    kernel = functools.partial(_decoder_kernel_tiled, true_b=true_b)
    # TODO(synk): marking the N axis "parallel" (v7x 2nd TensorCore) requires a
    # per-core trunk recompute instead of the pid==0 scratch init; kept
    # "arbitrary" for correctness.
    out = pl.pallas_call(
        kernel,
        out_shape=jax.ShapeDtypeStruct((b_pad, n_pad), jnp.float32),
        grid=grid,
        in_specs=[_resident_spec(z.shape), _resident_spec(w1.shape),
                  _resident_spec(w2.shape), _resident_spec(w3.shape),
                  _resident_spec(w4.shape), _resident_spec(gb.shape),
                  pl.BlockSpec((512, tn), lambda j: (0, j)),
                  pl.BlockSpec((1, tn), lambda j: (0, j))],
        out_specs=pl.BlockSpec((b_pad, tn), lambda j: (0, j)),
        scratch_shapes=[pltpu.VMEM((b_pad, 512), jnp.bfloat16)],
        compiler_params=pltpu.CompilerParams(
            dimension_semantics=("arbitrary",),
            vmem_limit_bytes=_vmem_limit(resident)),
    )(z, w1, w2, w3, w4, gb, w5, b5)

    if b_pad != true_b or n_pad != n_out:
        out = out[:true_b, :n_out]
    return out.reshape(true_b, 4, signal_len)


if __name__ == "__main__":
    nhid = 16
    ncond = 0
    signal_len = 8
    batch = 8

    key = jax.random.PRNGKey(0)
    k_param, k_z = jax.random.split(key)

    params = init_params(k_param, nhid, ncond, signal_len)
    z = jax.random.normal(k_z, (batch, nhid + ncond), dtype=jnp.float32)

    # Main path: fully fused, no grid, output written at its exact shape.
    out = jax.block_until_ready(decoder_forward(z, params, signal_len))
    assert out.shape == (batch, 4, signal_len), out.shape
    assert out.dtype == jnp.float32
    assert bool(jnp.all(out >= 0.0))  # ReLU output

    # Batch-padding path (B not a multiple of 8): padded rows excluded from BN.
    out_odd = jax.block_until_ready(decoder_forward(z[:5], params, signal_len))
    assert out_odd.shape == (5, 4, signal_len), out_odd.shape
    assert bool(jnp.all(out_odd >= 0.0))

    # Tiled final-projection path (used automatically for large 4*signal_len).
    sl2 = 96
    params2 = init_params(k_param, nhid, ncond, sl2)
    out_t = jax.block_until_ready(
        decoder_forward(z, params2, sl2, force_tiled=True))
    assert out_t.shape == (batch, 4, sl2), out_t.shape
    assert bool(jnp.all(out_t >= 0.0))

    print("KERNEL_OK")
</pallas_src>

<mosaic_0001>
module attributes {stable_mosaic.version = 11 : i64} {
  func.func @_decoder_kernel_fused(%arg0: memref<8x16xf32, #tpu.memory_space<vmem>>, %arg1: memref<16x128xbf16, #tpu.memory_space<vmem>>, %arg2: memref<128x256xbf16, #tpu.memory_space<vmem>>, %arg3: memref<256x512xbf16, #tpu.memory_space<vmem>>, %arg4: memref<512x512xbf16, #tpu.memory_space<vmem>>, %arg5: memref<2x1408xf32, #tpu.memory_space<vmem>>, %arg6: memref<512x128xbf16, #tpu.memory_space<vmem>>, %arg7: memref<1x128xf32, #tpu.memory_space<vmem>>, %arg8: memref<8x32xf32, #tpu.memory_space<vmem>>) attributes {dimension_semantics = [], scalar_prefetch = 0 : i64, scratch_operands = 0 : i64, tpu.core_type = #tpu.core_type<tc>} {
    %c0 = arith.constant 0 : index
    %c0_0 = arith.constant 0 : index
    %0 = vector.load %arg5[%c0, %c0_0] : memref<2x1408xf32, #tpu.memory_space<vmem>>, vector<2x1408xf32>
    %c0_1 = arith.constant 0 : index
    %c0_2 = arith.constant 0 : index
    %1 = vector.load %arg0[%c0_1, %c0_2] : memref<8x16xf32, #tpu.memory_space<vmem>>, vector<8x16xf32>
    %2 = arith.truncf %1 : vector<8x16xf32> to vector<8x16xbf16>
    %c0_3 = arith.constant 0 : index
    %c0_4 = arith.constant 0 : index
    %3 = vector.load %arg1[%c0_3, %c0_4] : memref<16x128xbf16, #tpu.memory_space<vmem>>, vector<16x128xbf16>
    %cst = arith.constant dense<0.000000e+00> : vector<8x128xf32>
    %4 = tpu.matmul %2, %3, %cst {dimension_numbers = #tpu.dot_dimension_numbers<[1], [0], [0], [1], [0, 0, 1, 1], [], []>} : vector<8x16xbf16>, vector<16x128xbf16>, vector<8x128xf32> -> vector<8x128xf32>
    %cst_5 = arith.constant dense<0.000000e+00> : vector<128xf32>
    %5 = vector.multi_reduction <add>, %4, %cst_5 [0] : vector<8x128xf32> to vector<128xf32>
    %6 = vector.shape_cast %5 : vector<128xf32> to vector<1x128xf32>
    %cst_6 = arith.constant 1.250000e-01 : f32
    %7 = vector.broadcast %cst_6 : f32 to vector<1x128xf32>
    %8 = arith.mulf %6, %7 : vector<1x128xf32>
    %9 = arith.mulf %4, %4 : vector<8x128xf32>
    %cst_7 = arith.constant dense<0.000000e+00> : vector<128xf32>
    %10 = vector.multi_reduction <add>, %9, %cst_7 [0] : vector<8x128xf32> to vector<128xf32>
    %11 = vector.shape_cast %10 : vector<128xf32> to vector<1x128xf32>
    %cst_8 = arith.constant 1.250000e-01 : f32
    %12 = vector.broadcast %cst_8 : f32 to vector<1x128xf32>
    %13 = arith.mulf %11, %12 : vector<1x128xf32>
    %14 = arith.mulf %8, %8 : vector<1x128xf32>
    %15 = arith.subf %13, %14 : vector<1x128xf32>
    %cst_9 = arith.constant 0.000000e+00 : f32
    %16 = vector.broadcast %cst_9 : f32 to vector<1x128xf32>
    %17 = arith.maximumf %15, %16 : vector<1x128xf32>
    %18 = vector.extract_strided_slice %0 {offsets = [0, 0], sizes = [1, 128], strides = [1, 1]} : vector<2x1408xf32> to vector<1x128xf32>
    %19 = vector.extract_strided_slice %0 {offsets = [1, 0], sizes = [1, 128], strides = [1, 1]} : vector<2x1408xf32> to vector<1x128xf32>
    %cst_10 = arith.constant 9.99999974E-6 : f32
    %20 = vector.broadcast %cst_10 : f32 to vector<1x128xf32>
    %21 = arith.addf %17, %20 : vector<1x128xf32>
    %22 = math.rsqrt %21 : vector<1x128xf32>
    %23 = arith.mulf %18, %22 : vector<1x128xf32>
    %24 = arith.mulf %8, %23 : vector<1x128xf32>
    %25 = arith.subf %19, %24 : vector<1x128xf32>
    %26 = vector.broadcast %23 : vector<1x128xf32> to vector<8x128xf32>
    %27 = arith.mulf %4, %26 : vector<8x128xf32>
    %28 = vector.broadcast %25 : vector<1x128xf32> to vector<8x128xf32>
    %29 = arith.addf %27, %28 : vector<8x128xf32>
    %cst_11 = arith.constant 5.000000e-01 : f32
    %30 = vector.broadcast %cst_11 : f32 to vector<8x128xf32>
    %31 = arith.mulf %30, %29 : vector<8x128xf32>
    %32 = math.tanh %31 : vector<8x128xf32>
    %cst_12 = arith.constant 5.000000e-01 : f32
    %33 = vector.broadcast %cst_12 : f32 to vector<8x128xf32>
    %34 = arith.mulf %33, %32 : vector<8x128xf32>
    %cst_13 = arith.constant 5.000000e-01 : f32
    %35 = vector.broadcast %cst_13 : f32 to vector<8x128xf32>
    %36 = arith.addf %34, %35 : vector<8x128xf32>
    %37 = arith.truncf %36 : vector<8x128xf32> to vector<8x128xbf16>
    %c0_14 = arith.constant 0 : index
    %c0_15 = arith.constant 0 : index
    %38 = vector.load %arg2[%c0_14, %c0_15] : memref<128x256xbf16, #tpu.memory_space<vmem>>, vector<128x256xbf16>
    %cst_16 = arith.constant dense<0.000000e+00> : vector<8x256xf32>
    %39 = tpu.matmul %37, %38, %cst_16 {dimension_numbers = #tpu.dot_dimension_numbers<[1], [0], [0], [1], [0, 0, 1, 1], [], []>} : vector<8x128xbf16>, vector<128x256xbf16>, vector<8x256xf32> -> vector<8x256xf32>
    %cst_17 = arith.constant dense<0.000000e+00> : vector<256xf32>
    %40 = vector.multi_reduction <add>, %39, %cst_17 [0] : vector<8x256xf32> to vector<256xf32>
    %41 = vector.shape_cast %40 : vector<256xf32> to vector<1x256xf32>
    %cst_18 = arith.constant 1.250000e-01 : f32
    %42 = vector.broadcast %cst_18 : f32 to vector<1x256xf32>
    %43 = arith.mulf %41, %42 : vector<1x256xf32>
    %44 = arith.mulf %39, %39 : vector<8x256xf32>
    %cst_19 = arith.constant dense<0.000000e+00> : vector<256xf32>
    %45 = vector.multi_reduction <add>, %44, %cst_19 [0] : vector<8x256xf32> to vector<256xf32>
    %46 = vector.shape_cast %45 : vector<256xf32> to vector<1x256xf32>
    %cst_20 = arith.constant 1.250000e-01 : f32
    %47 = vector.broadcast %cst_20 : f32 to vector<1x256xf32>
    %48 = arith.mulf %46, %47 : vector<1x256xf32>
    %49 = arith.mulf %43, %43 : vector<1x256xf32>
    %50 = arith.subf %48, %49 : vector<1x256xf32>
    %cst_21 = arith.constant 0.000000e+00 : f32
    %51 = vector.broadcast %cst_21 : f32 to vector<1x256xf32>
    %52 = arith.maximumf %50, %51 : vector<1x256xf32>
    %53 = vector.extract_strided_slice %0 {offsets = [0, 128], sizes = [1, 256], strides = [1, 1]} : vector<2x1408xf32> to vector<1x256xf32>
    %54 = vector.extract_strided_slice %0 {offsets = [1, 128], sizes = [1, 256], strides = [1, 1]} : vector<2x1408xf32> to vector<1x256xf32>
    %cst_22 = arith.constant 9.99999974E-6 : f32
    %55 = vector.broadcast %cst_22 : f32 to vector<1x256xf32>
    %56 = arith.addf %52, %55 : vector<1x256xf32>
    %57 = math.rsqrt %56 : vector<1x256xf32>
    %58 = arith.mulf %53, %57 : vector<1x256xf32>
    %59 = arith.mulf %43, %58 : vector<1x256xf32>
    %60 = arith.subf %54, %59 : vector<1x256xf32>
    %61 = vector.broadcast %58 : vector<1x256xf32> to vector<8x256xf32>
    %62 = arith.mulf %39, %61 : vector<8x256xf32>
    %63 = vector.broadcast %60 : vector<1x256xf32> to vector<8x256xf32>
    %64 = arith.addf %62, %63 : vector<8x256xf32>
    %cst_23 = arith.constant 5.000000e-01 : f32
    %65 = vector.broadcast %cst_23 : f32 to vector<8x256xf32>
    %66 = arith.mulf %65, %64 : vector<8x256xf32>
    %67 = math.tanh %66 : vector<8x256xf32>
    %cst_24 = arith.constant 5.000000e-01 : f32
    %68 = vector.broadcast %cst_24 : f32 to vector<8x256xf32>
    %69 = arith.mulf %68, %67 : vector<8x256xf32>
    %cst_25 = arith.constant 5.000000e-01 : f32
    %70 = vector.broadcast %cst_25 : f32 to vector<8x256xf32>
    %71 = arith.addf %69, %70 : vector<8x256xf32>
    %72 = arith.truncf %71 : vector<8x256xf32> to vector<8x256xbf16>
    %c0_26 = arith.constant 0 : index
    %c0_27 = arith.constant 0 : index
    %73 = vector.load %arg3[%c0_26, %c0_27] : memref<256x512xbf16, #tpu.memory_space<vmem>>, vector<256x512xbf16>
    %cst_28 = arith.constant dense<0.000000e+00> : vector<8x512xf32>
    %74 = tpu.matmul %72, %73, %cst_28 {dimension_numbers = #tpu.dot_dimension_numbers<[1], [0], [0], [1], [0, 0, 1, 1], [], []>} : vector<8x256xbf16>, vector<256x512xbf16>, vector<8x512xf32> -> vector<8x512xf32>
    %cst_29 = arith.constant dense<0.000000e+00> : vector<512xf32>
    %75 = vector.multi_reduction <add>, %74, %cst_29 [0] : vector<8x512xf32> to vector<512xf32>
    %76 = vector.shape_cast %75 : vector<512xf32> to vector<1x512xf32>
    %cst_30 = arith.constant 1.250000e-01 : f32
    %77 = vector.broadcast %cst_30 : f32 to vector<1x512xf32>
    %78 = arith.mulf %76, %77 : vector<1x512xf32>
    %79 = arith.mulf %74, %74 : vector<8x512xf32>
    %cst_31 = arith.constant dense<0.000000e+00> : vector<512xf32>
    %80 = vector.multi_reduction <add>, %79, %cst_31 [0] : vector<8x512xf32> to vector<512xf32>
    %81 = vector.shape_cast %80 : vector<512xf32> to vector<1x512xf32>
    %cst_32 = arith.constant 1.250000e-01 : f32
    %82 = vector.broadcast %cst_32 : f32 to vector<1x512xf32>
    %83 = arith.mulf %81, %82 : vector<1x512xf32>
    %84 = arith.mulf %78, %78 : vector<1x512xf32>
    %85 = arith.subf %83, %84 : vector<1x512xf32>
    %cst_33 = arith.constant 0.000000e+00 : f32
    %86 = vector.broadcast %cst_33 : f32 to vector<1x512xf32>
    %87 = arith.maximumf %85, %86 : vector<1x512xf32>
    %88 = vector.extract_strided_slice %0 {offsets = [0, 384], sizes = [1, 512], strides = [1, 1]} : vector<2x1408xf32> to vector<1x512xf32>
    %89 = vector.extract_strided_slice %0 {offsets = [1, 384], sizes = [1, 512], strides = [1, 1]} : vector<2x1408xf32> to vector<1x512xf32>
    %cst_34 = arith.constant 9.99999974E-6 : f32
    %90 = vector.broadcast %cst_34 : f32 to vector<1x512xf32>
    %91 = arith.addf %87, %90 : vector<1x512xf32>
    %92 = math.rsqrt %91 : vector<1x512xf32>
    %93 = arith.mulf %88, %92 : vector<1x512xf32>
    %94 = arith.mulf %78, %93 : vector<1x512xf32>
    %95 = arith.subf %89, %94 : vector<1x512xf32>
    %96 = vector.broadcast %93 : vector<1x512xf32> to vector<8x512xf32>
    %97 = arith.mulf %74, %96 : vector<8x512xf32>
    %98 = vector.broadcast %95 : vector<1x512xf32> to vector<8x512xf32>
    %99 = arith.addf %97, %98 : vector<8x512xf32>
    %cst_35 = arith.constant 5.000000e-01 : f32
    %100 = vector.broadcast %cst_35 : f32 to vector<8x512xf32>
    %101 = arith.mulf %100, %99 : vector<8x512xf32>
    %102 = math.tanh %101 : vector<8x512xf32>
    %cst_36 = arith.constant 5.000000e-01 : f32
    %103 = vector.broadcast %cst_36 : f32 to vector<8x512xf32>
    %104 = arith.mulf %103, %102 : vector<8x512xf32>
    %cst_37 = arith.constant 5.000000e-01 : f32
    %105 = vector.broadcast %cst_37 : f32 to vector<8x512xf32>
    %106 = arith.addf %104, %105 : vector<8x512xf32>
    %107 = arith.truncf %106 : vector<8x512xf32> to vector<8x512xbf16>
    %c0_38 = arith.constant 0 : index
    %c0_39 = arith.constant 0 : index
    %108 = vector.load %arg4[%c0_38, %c0_39] : memref<512x512xbf16, #tpu.memory_space<vmem>>, vector<512x512xbf16>
    %cst_40 = arith.constant dense<0.000000e+00> : vector<8x512xf32>
    %109 = tpu.matmul %107, %108, %cst_40 {dimension_numbers = #tpu.dot_dimension_numbers<[1], [0], [0], [1], [0, 0, 1, 1], [], []>} : vector<8x512xbf16>, vector<512x512xbf16>, vector<8x512xf32> -> vector<8x512xf32>
    %cst_41 = arith.constant dense<0.000000e+00> : vector<512xf32>
    %110 = vector.multi_reduction <add>, %109, %cst_41 [0] : vector<8x512xf32> to vector<512xf32>
    %111 = vector.shape_cast %110 : vector<512xf32> to vector<1x512xf32>
    %cst_42 = arith.constant 1.250000e-01 : f32
    %112 = vector.broadcast %cst_42 : f32 to vector<1x512xf32>
    %113 = arith.mulf %111, %112 : vector<1x512xf32>
    %114 = arith.mulf %109, %109 : vector<8x512xf32>
    %cst_43 = arith.constant dense<0.000000e+00> : vector<512xf32>
    %115 = vector.multi_reduction <add>, %114, %cst_43 [0] : vector<8x512xf32> to vector<512xf32>
    %116 = vector.shape_cast %115 : vector<512xf32> to vector<1x512xf32>
    %cst_44 = arith.constant 1.250000e-01 : f32
    %117 = vector.broadcast %cst_44 : f32 to vector<1x512xf32>
    %118 = arith.mulf %116, %117 : vector<1x512xf32>
    %119 = arith.mulf %113, %113 : vector<1x512xf32>
    %120 = arith.subf %118, %119 : vector<1x512xf32>
    %cst_45 = arith.constant 0.000000e+00 : f32
    %121 = vector.broadcast %cst_45 : f32 to vector<1x512xf32>
    %122 = arith.maximumf %120, %121 : vector<1x512xf32>
    %123 = vector.extract_strided_slice %0 {offsets = [0, 896], sizes = [1, 512], strides = [1, 1]} : vector<2x1408xf32> to vector<1x512xf32>
    %124 = vector.extract_strided_slice %0 {offsets = [1, 896], sizes = [1, 512], strides = [1, 1]} : vector<2x1408xf32> to vector<1x512xf32>
    %cst_46 = arith.constant 9.99999974E-6 : f32
    %125 = vector.broadcast %cst_46 : f32 to vector<1x512xf32>
    %126 = arith.addf %122, %125 : vector<1x512xf32>
    %127 = math.rsqrt %126 : vector<1x512xf32>
    %128 = arith.mulf %123, %127 : vector<1x512xf32>
    %129 = arith.mulf %113, %128 : vector<1x512xf32>
    %130 = arith.subf %124, %129 : vector<1x512xf32>
    %131 = vector.broadcast %128 : vector<1x512xf32> to vector<8x512xf32>
    %132 = arith.mulf %109, %131 : vector<8x512xf32>
    %133 = vector.broadcast %130 : vector<1x512xf32> to vector<8x512xf32>
    %134 = arith.addf %132, %133 : vector<8x512xf32>
    %cst_47 = arith.constant 5.000000e-01 : f32
    %135 = vector.broadcast %cst_47 : f32 to vector<8x512xf32>
    %136 = arith.mulf %135, %134 : vector<8x512xf32>
    %137 = math.tanh %136 : vector<8x512xf32>
    %cst_48 = arith.constant 5.000000e-01 : f32
    %138 = vector.broadcast %cst_48 : f32 to vector<8x512xf32>
    %139 = arith.mulf %138, %137 : vector<8x512xf32>
    %cst_49 = arith.constant 5.000000e-01 : f32
    %140 = vector.broadcast %cst_49 : f32 to vector<8x512xf32>
    %141 = arith.addf %139, %140 : vector<8x512xf32>
    %142 = arith.truncf %141 : vector<8x512xf32> to vector<8x512xbf16>
    %c0_50 = arith.constant 0 : index
    %c0_51 = arith.constant 0 : index
    %143 = vector.load %arg6[%c0_50, %c0_51] : memref<512x128xbf16, #tpu.memory_space<vmem>>, vector<512x128xbf16>
    %cst_52 = arith.constant dense<0.000000e+00> : vector<8x128xf32>
    %144 = tpu.matmul %142, %143, %cst_52 {dimension_numbers = #tpu.dot_dimension_numbers<[1], [0], [0], [1], [0, 0, 1, 1], [], []>} : vector<8x512xbf16>, vector<512x128xbf16>, vector<8x128xf32> -> vector<8x128xf32>
    %c0_53 = arith.constant 0 : index
    %c0_54 = arith.constant 0 : index
    %145 = vector.load %arg7[%c0_53, %c0_54] : memref<1x128xf32, #tpu.memory_space<vmem>>, vector<1x128xf32>
    %146 = vector.broadcast %145 : vector<1x128xf32> to vector<8x128xf32>
    %147 = arith.addf %144, %146 : vector<8x128xf32>
    %cst_55 = arith.constant 0.000000e+00 : f32
    %148 = vector.broadcast %cst_55 : f32 to vector<8x128xf32>
    %149 = arith.maximumf %147, %148 : vector<8x128xf32>
    %150 = vector.extract_strided_slice %149 {offsets = [0, 0], sizes = [8, 32], strides = [1, 1]} : vector<8x128xf32> to vector<8x32xf32>
    %c0_56 = arith.constant 0 : index
    %c0_57 = arith.constant 0 : index
    %151 = vector.load %arg8[%c0_56, %c0_57] : memref<8x32xf32, #tpu.memory_space<vmem>>, vector<8x32xf32>
    tpu.vector_store %arg8[%c0_56, %c0_57], %150 {strides = array<i32>} : memref<8x32xf32, #tpu.memory_space<vmem>>, vector<8x32xf32>,
    return
  }
}

</mosaic_0001>

<bundles_post_ra>
// kernel: tpu_custom_call.1
= control target key start
LH: loop header
LB: loop body
LE: loop exit
PB: predicated region body
PF: predicated region fallthrough
CT: control target
= control target key end

     0   :  { %13 = vsyncpa [#allocation3], 0  ;;  %s3950_s0 = inlined_call_operand.hbm [shape: f32[8,16], index: 0, kind: input, shape index: {}]   ;;  %s3951_s1 = inlined_call_operand.hbm [shape: bf16[16,128], index: 1, kind: input, shape index: {}]   ;;  %s3952_s2 = inlined_call_operand.hbm [shape: bf16[128,256], index: 2, kind: input, shape index: {}]   ;;  %s3953_s3 = inlined_call_operand.hbm [shape: bf16[256,512], index: 3, kind: input, shape index: {}]   ;;  %s3954_s4 = inlined_call_operand.hbm [shape: bf16[512,512], index: 4, kind: input, shape index: {}]   ;;  %s3955_s5 = inlined_call_operand.hbm [shape: f32[2,1408], index: 5, kind: input, shape index: {}]   ;;  %s3956_s6 = inlined_call_operand.hbm [shape: bf16[512,128], index: 6, kind: input, shape index: {}]   ;;  %s3957_s7 = inlined_call_operand.vmem [shape: f32[1,128], index: 7, kind: input, shape index: {}]   ;;  %s3958_s8 = inlined_call_operand.hbm [shape: f32[8,32], index: 8, kind: output, shape index: {}]  }
   0x1   :  { %14 = vsyncpa [#allocation6], 0 }
   0x2   :  { %15 = vsyncpa [#allocation9], 0 }
   0x3   :  { %16 = vsyncpa [#allocation12], 0 }
   0x4   :  { %17 = vsyncpa [#allocation4], 0  ;;  %s3620_s27 = smov [#allocation5]   ;;  %s3434_s9 = scalar_lea.hbm %s3951_s1, 128 }
   0x5   :  { %s33_s28 = sshll.u32 %s3620_s27, 4  ;;  %p3435_p0 = scmp.ne.s32.totalorder %s3951_s1, %s3434_s9  ;;  %s34_s28 = int_to_ptr.vmem [resolvable:$true] %s33_s28 }
   0x6   :  { %p3438_p1 = scmp.lt.u32.totalorder %s3434_s9, %s3951_s1 }
   0x8   :  { %p3440_p2 = pnand %p3438_p1, %p3435_p0 }
   0xa   :  { %3443 = shalt.err (!%p3440_p2)
}
   0xb   :  { %s3444_s14 = scalar_lea.vmem %s34_s28, 128  ;;  %p3449_p4 = scmp.lt.s32.totalorder %s34_s28, %s34_s28 }
   0xc   :  { %p3445_p3 = scmp.ne.s32.totalorder %s34_s28, %s3444_s14  ;;  %p3450_p5 = scmp.lt.s32.totalorder %s3444_s14, %s3444_s14 }
   0xe   :  { %p3451_p6 = por %p3450_p5, %p3449_p4 }
  0x10   :  { %p3452_p7 = pnand %p3451_p6, %p3445_p3 }
  0x12   :  { %3455 = shalt.err (!%p3452_p7)
}
  0x13   :  { %s3621_s15 = smov 64   ;;  %s3622_s16 = smov 4  }
  0x14   :  { %39 = dma.hbm_to_vmem [thread:$0]  %s3951_s1, 128, %s34_s28, [#allocation6], %s3621_s15, %s3621_s15, %s3622_s16  }
  0x15   :  { %s3623_s19 = smov [#allocation8]   ;;  %s3456_s23 = scalar_lea.hbm %s3953_s3, 8192 }
  0x16   :  { %s57_s20 = sshll.u32 %s3623_s19, 4  ;;  %p3457_p8 = scmp.ne.s32.totalorder %s3953_s3, %s3456_s23  ;;  %s58_s20 = int_to_ptr.vmem [resolvable:$true] %s57_s20 }
  0x17   :  { %p3460_p9 = scmp.lt.u32.totalorder %s3456_s23, %s3953_s3 }
  0x19   :  { %p3462_p10 = pnand %p3460_p9, %p3457_p8 }
  0x1b   :  { %3465 = shalt.err (!%p3462_p10)
}
  0x1c   :  { %s3466_s29 = scalar_lea.vmem %s58_s20, 8192  ;;  %p3471_p12 = scmp.lt.s32.totalorder %s58_s20, %s58_s20 }
  0x1d   :  { %p3467_p11 = scmp.ne.s32.totalorder %s58_s20, %s3466_s29  ;;  %p3472_p13 = scmp.lt.s32.totalorder %s3466_s29, %s3466_s29 }
  0x1f   :  { %p3473_p0 = por %p3472_p13, %p3471_p12 }
  0x21   :  { %p3474_p1 = pnand %p3473_p0, %p3467_p11 }
  0x23   :  { %3477 = shalt.err (!%p3474_p1)
}
  0x24   :  { %s3624_s1 = smov 256   ;;  %s3625_s28 = smov 16  }
  0x25   :  { %63 = dma.hbm_to_vmem [thread:$0]  %s3953_s3, 8192, %s58_s20, [#allocation9], %s3624_s1, %s3624_s1, %s3625_s28  }
  0x26   :  { %s3626_s10 = smov [#allocation11]   ;;  %s3627_s12 = smov [#allocation2]  }
  0x27   :  { %s82_s11 = sshll.u32 %s3626_s10, 4  ;;  %s24_s13 = sshll.u32 %s3627_s12, 4  ;;  %s83_s11 = int_to_ptr.vmem [resolvable:$true] %s82_s11  ;;  %s25_s13 = int_to_ptr.vmem [resolvable:$true] %s24_s13 }
  0x28   :  { %s3478_s18 = scalar_lea.hbm %s3955_s5, 352 }
  0x29   :  { %p3479_p2 = scmp.ne.s32.totalorder %s3955_s5, %s3478_s18  ;;  %p3482_p3 = scmp.lt.u32.totalorder %s3478_s18, %s3955_s5 }
  0x2b   :  { %p3484_p4 = pnand %p3482_p3, %p3479_p2 }
  0x2d   :  { %3487 = shalt.err (!%p3484_p4)
}
  0x2e   :  { %s3488_s3 = scalar_lea.vmem %s83_s11, 352  ;;  %p3493_p6 = scmp.lt.s32.totalorder %s83_s11, %s83_s11 }
  0x2f   :  { %p3489_p5 = scmp.ne.s32.totalorder %s83_s11, %s3488_s3  ;;  %p3494_p7 = scmp.lt.s32.totalorder %s3488_s3, %s3488_s3 }
  0x31   :  { %p3495_p8 = por %p3494_p7, %p3493_p6 }
  0x33   :  { %p3496_p9 = pnand %p3495_p8, %p3489_p5 }
  0x35   :  { %3499 = shalt.err (!%p3496_p9)
}
  0x36   :  { %85 = dma.hbm_to_vmem [thread:$0]  %s3955_s5, 352, %s83_s11, [#allocation12]  }
  0x37   :  { %s3500_s27 = scalar_lea.hbm %s3950_s0, 128 }
  0x38   :  { %p3501_p10 = scmp.ne.s32.totalorder %s3950_s0, %s3500_s27  ;;  %p3504_p11 = scmp.lt.u32.totalorder %s3500_s27, %s3950_s0 }
  0x3a   :  { %p3506_p12 = pnand %p3504_p11, %p3501_p10 }
  0x3c   :  { %3509 = shalt.err (!%p3506_p12)
}
  0x3d   :  { %s3510_s12 = scalar_lea.vmem %s25_s13, 128  ;;  %p3515_p0 = scmp.lt.s32.totalorder %s25_s13, %s25_s13 }
  0x3e   :  { %p3511_p13 = scmp.ne.s32.totalorder %s25_s13, %s3510_s12  ;;  %p3516_p1 = scmp.lt.s32.totalorder %s3510_s12, %s3510_s12 }
  0x40   :  { %p3517_p2 = por %p3516_p1, %p3515_p0 }
  0x42   :  { %p3518_p3 = pnand %p3517_p2, %p3511_p13 }
  0x44   :  { %3521 = shalt.err (!%p3518_p3)
}
  0x45   :  { %27 = dma.hbm_to_vmem [thread:$0]  %s3950_s0, 128, %s25_s13, [#allocation3]  }
  0x46   :  { %s3628_s14 = smov [#allocation7]   ;;  %s3522_s21 = scalar_lea.hbm %s3952_s2, 2048 }
  0x47   :  { %s45_s17 = sshll.u32 %s3628_s14, 4  ;;  %p3523_p4 = scmp.ne.s32.totalorder %s3952_s2, %s3522_s21  ;;  %s46_s17 = int_to_ptr.vmem [resolvable:$true] %s45_s17 }
  0x48   :  { %p3526_p5 = scmp.lt.u32.totalorder %s3522_s21, %s3952_s2 }
  0x4a   :  { %p3528_p6 = pnand %p3526_p5, %p3523_p4 }
  0x4c   :  { %3531 = shalt.err (!%p3528_p6)
}
  0x4d   :  { %s3532_s24 = scalar_lea.vmem %s46_s17, 2048  ;;  %p3537_p8 = scmp.lt.s32.totalorder %s46_s17, %s46_s17 }
  0x4e   :  { %p3533_p7 = scmp.ne.s32.totalorder %s46_s17, %s3532_s24  ;;  %p3538_p9 = scmp.lt.s32.totalorder %s3532_s24, %s3532_s24 }
  0x50   :  { %p3539_p10 = por %p3538_p9, %p3537_p8 }
  0x52   :  { %p3540_p11 = pnand %p3539_p10, %p3533_p7 }
  0x54   :  { %3543 = shalt.err (!%p3540_p11)
}
  0x55   :  { %s3629_s0 = smov 128   ;;  %s3630_s13 = smov 8  }
  0x56   :  { %51 = dma.hbm_to_vmem [thread:$0]  %s3952_s2, 2048, %s46_s17, [#allocation6], %s3629_s0, %s3629_s0, %s3630_s13  }
  0x57   :  { %s3631_s27 = smov [#allocation10]   ;;  %s3632_s30 = smov [#allocation13]  }
  0x58   :  { %s69_s29 = sshll.u32 %s3631_s27, 4  ;;  %s91_s9 = sshll.u32 %s3632_s30, 4  ;;  %s70_s29 = int_to_ptr.vmem [resolvable:$true] %s69_s29  ;;  %s92_s9 = int_to_ptr.vmem [resolvable:$true] %s91_s9 }
  0x59   :  { %s3544_s5 = scalar_lea.hbm %s3954_s4, 16384 }
  0x5a   :  { %p3545_p12 = scmp.ne.s32.totalorder %s3954_s4, %s3544_s5  ;;  %p3548_p13 = scmp.lt.u32.totalorder %s3544_s5, %s3954_s4 }
  0x5c   :  { %p3550_p0 = pnand %p3548_p13, %p3545_p12 }
  0x5e   :  { %3553 = shalt.err (!%p3550_p0)
}
  0x5f   :  { %s3554_s2 = scalar_lea.vmem %s70_s29, 16384  ;;  %p3559_p2 = scmp.lt.s32.totalorder %s70_s29, %s70_s29 }
  0x60   :  { %p3555_p1 = scmp.ne.s32.totalorder %s70_s29, %s3554_s2  ;;  %p3560_p3 = scmp.lt.s32.totalorder %s3554_s2, %s3554_s2 }
  0x62   :  { %p3561_p4 = por %p3560_p3, %p3559_p2 }
  0x64   :  { %p3562_p5 = pnand %p3561_p4, %p3555_p1 }
  0x66   :  { %3565 = shalt.err (!%p3562_p5)
}
  0x67   :  { %75 = dma.hbm_to_vmem [thread:$0]  %s3954_s4, 16384, %s70_s29, [#allocation9], %s3624_s1, %s3624_s1, %s3625_s28  }
  0x68   :  { %s3566_s3 = scalar_lea.hbm %s3956_s6, 4096 }
  0x69   :  { %p3567_p6 = scmp.ne.s32.totalorder %s3956_s6, %s3566_s3  ;;  %p3570_p7 = scmp.lt.u32.totalorder %s3566_s3, %s3956_s6 }
  0x6b   :  { %p3572_p8 = pnand %p3570_p7, %p3567_p6 }
  0x6d   :  { %3575 = shalt.err (!%p3572_p8)
}
  0x6e   :  { %s3576_s25 = scalar_lea.vmem %s92_s9, 4096  ;;  %p3581_p10 = scmp.lt.s32.totalorder %s92_s9, %s92_s9 }
  0x6f   :  { %p3577_p9 = scmp.ne.s32.totalorder %s92_s9, %s3576_s25  ;;  %p3582_p11 = scmp.lt.s32.totalorder %s3576_s25, %s3576_s25 }
  0x71   :  { %p3583_p12 = por %p3582_p11, %p3581_p10 }
  0x73   :  { %p3584_p13 = pnand %p3583_p12, %p3577_p9 }
  0x75   :  { %3587 = shalt.err (!%p3584_p13)
}
  0x76   :  { %97 = dma.hbm_to_vmem [thread:$0]  %s3956_s6, 4096, %s92_s9, [#allocation12], %s3621_s15, %s3621_s15, %s3622_s16  }
  0x77   :  { %3610 = dma.done.wait [#allocation3], 128  }
  0x78   :  { %3611 = vsyncadd [#allocation3], 4294967168 }
  0x79   :  { %3612 = dma.done.wait [#allocation6], 2176  }
  0x7a   :  { %3613 = vsyncadd [#allocation6], 4294965120 }
  0x7b   :  { %3614 = dma.done.wait [#allocation9], 24576  }
  0x7c   :  { %3615 = vsyncadd [#allocation9], 4294942720 }
  0x7d   :  { %3616 = dma.done.wait [#allocation12], 4448  }
  0x7e   :  { %3617 = vsyncadd [#allocation12], 4294962848  ;;  %v3633_v0 = vmov 0.0   ;;  %vm3634_vm0 = vmmov 0   ;;  %v3045_v1 = vld [vmem:[#allocation5] sm:$0xff]   ;;  %v125_v2 = vld [vmem:[#allocation2] sm:$0xff]  ;;  %v205_v46 = vlaneseq }
  0x7f   :  { %3013 = vmatprep.subr.bf16.mxu0 %v3633_v0  ;;  %3015 = vmatprep.mubr.msk.bf16.mxu0 %vm3634_vm0, %v3633_v0  ;;  %v126_v3 = vpack.c.bf16 %v125_v2, %v125_v2  ;;  %vm135_vm1 = vcmask 130048   ;;  %v3046_v4 = vld [vmem:[#allocation7 + $0x4] ss:$8 sps:$4 sm:$0xff]   ;;  %v3048_v5 = vld [vmem:[#allocation7] ss:$8 sps:$4 sm:$0xff]   ;;  %v3635_v13 = vmov 0  }
  0x80   :  { %3014 = vmatpush3.bf16.msra.mxu0 %v3045_v1  ;;  %323 = vmatprep.subr.bf16.mxu1 %v3046_v4  ;;  %v3049_v6 = vld [vmem:[#allocation7 + $0x14] ss:$8 sps:$4 sm:$0xff]   ;;  %v3051_v7 = vld [vmem:[#allocation7 + $0x10] ss:$8 sps:$4 sm:$0xff]   ;;  %v3052_v8 = vld [vmem:[#allocation7 + $0x24] ss:$8 sps:$4 sm:$0xff]  }
  0x81   :  { %324 = vmatpush1.bf16.msra.mxu1 %v3048_v5  ;;  %v3054_v9 = vld [vmem:[#allocation7 + $0x20] ss:$8 sps:$4 sm:$0xff]   ;;  %v3055_v10 = vld [vmem:[#allocation7 + $0x34] ss:$8 sps:$4 sm:$0xff]   ;;  %v3057_v11 = vld [vmem:[#allocation7 + $0x30] ss:$8 sps:$4 sm:$0xff]   ;;  %355 = vmatprep.mubr.bf16.mxu1 %v3635_v13 }
  0x82   :  { %325 = vmatprep.subr.bf16.mxu1 %v3049_v6  ;;  %v3058_v12 = vld [vmem:[#allocation7 + $0x44] ss:$8 sps:$4 sm:$0xff]   ;;  %v3060_v14 = vld [vmem:[#allocation7 + $0x40] ss:$8 sps:$4 sm:$0xff]   ;;  %v3061_v15 = vld [vmem:[#allocation7 + $0x54] ss:$8 sps:$4 sm:$0xff]  }
  0x83   :  { %3016 = vmatmul.mubr.msk.bf16.vlgmr.msra.gmra.mrb[0].mxu0 %vm135_vm1, %v126_v3  ;;  %v3063_v16 = vld [vmem:[#allocation7 + $0x50] ss:$8 sps:$4 sm:$0xff]   ;;  %v3064_v17 = vld [vmem:[#allocation7 + $0x64] ss:$8 sps:$4 sm:$0xff]   ;;  %v3066_v18 = vld [vmem:[#allocation7 + $0x60] ss:$8 sps:$4 sm:$0xff]  }
  0x84   :  { %v3067_v19 = vld [vmem:[#allocation7 + $0x74] ss:$8 sps:$4 sm:$0xff]   ;;  %v3069_v20 = vld [vmem:[#allocation7 + $0x70] ss:$8 sps:$4 sm:$0xff]   ;;  %v3636_v44 = vmov 1983009808  }
  0x85   :  { %326 = vmatpush1.bf16.msra.mxu1 %v3051_v7  ;;  %v203_v45 = vunpack.c.l.s4 %v3636_v44  ;;  %v3779_v48 = vld [vmem:[#allocation11] sm:$0xff]  ;;  %v3781_v49 = vshrl.u32 %v205_v46, 7  ;;  %v3075_v5 = vld [vmem:[#allocation8 + $0xc] ss:$16 sps:$4 sm:$0xff]   ;;  %v3073_v7 = vld [vmem:[#allocation8 + $0x8] ss:$16 sps:$4 sm:$0xff]  }
  0x86   :  { %327 = vmatprep.subr.bf16.mxu1 %v3052_v8  ;;  %v3072_v4 = vld [vmem:[#allocation8 + $0x4] ss:$16 sps:$4 sm:$0xff]   ;;  %v3070_v6 = vld [vmem:[#allocation8] ss:$16 sps:$4 sm:$0xff]   ;;  %v3087_v13 = vld [vmem:[#allocation8 + $0x4c] ss:$16 sps:$4 sm:$0xff]  }
  0x87   :  { %v204_v47 = vunpack.c.0.s8 %v203_v45  ;;  %v3788_v54 = vsub.s32 0, %v3781_v49  ;;  %v3793_v58 = vsub.s32 1, %v3781_v49  ;;  %870 = vmatprep.subr.bf16.mxu0 %v3072_v4  ;;  %v3078_v8 = vld [vmem:[#allocation8 + $0x24] ss:$16 sps:$4 sm:$0xff]   ;;  %v3135_v45 = vld [vmem:[#allocation8 + $0x14c] ss:$16 sps:$4 sm:$0xff]  }
  0x88   :  { %871 = vmatpush1.bf16.msra.mxu0 %v3070_v6  ;;  %v3132_v44 = vld [vmem:[#allocation8 + $0x144] ss:$16 sps:$4 sm:$0xff]   ;;  %v3130_v46 = vld [vmem:[#allocation8 + $0x140] ss:$16 sps:$4 sm:$0xff]   ;;  %v3157_v4 = vld [vmem:[#allocation8 + $0x1c8] ss:$16 sps:$4 sm:$0xff]  }
  0x89   :  { %328 = vmatpush1.bf16.msra.mxu1 %v3054_v9  ;;  %v3785_v52 = vsub.s32 %v204_v47, %v3781_v49  ;;  %v3081_v9 = vld [vmem:[#allocation8 + $0x2c] ss:$16 sps:$4 sm:$0xff]   ;;  %872 = vmatprep.subr.bf16.mxu0 %v3078_v8  ;;  %v3133_v47 = vld [vmem:[#allocation8 + $0x148] ss:$16 sps:$4 sm:$0xff]   ;;  %vm1035_vm2 = vcmask 1041408   ;;  %s3637_s16 = smov [#allocation14]  }
  0x8a   :  { %329 = vmatprep.subr.bf16.mxu1 %v3055_v10  ;;  %v3076_v10 = vld [vmem:[#allocation8 + $0x20] ss:$16 sps:$4 sm:$0xff]   ;;  %v3165_v6 = vld [vmem:[#allocation8 + $0x1ec] ss:$16 sps:$4 sm:$0xff]   ;;  %v3163_v8 = vld [vmem:[#allocation8 + $0x1e8] ss:$16 sps:$4 sm:$0xff]  }
  0x8b   :  { %s2712_s28 = sshll.u32 %s3637_s16, 4  ;;  %vm2704_vm3 = vcmask 261120   ;;  %s2713_s28 = int_to_ptr.vmem [resolvable:$true] %s2712_s28 }
  0x8c   :  { %873 = vmatpush1.bf16.msra.mxu0 %v3076_v10  ;;  %s3588_s26 = scalar_lea.vmem %s2713_s28, 128  ;;  %p3593_p1 = scmp.lt.s32.totalorder %s2713_s28, %s2713_s28 }
  0x8d   :  { %330 = vmatpush1.bf16.msra.mxu1 %v3057_v11  ;;  %v3079_v11 = vld [vmem:[#allocation8 + $0x28] ss:$16 sps:$4 sm:$0xff]   ;;  %p3589_p0 = scmp.ne.s32.totalorder %s2713_s28, %s3588_s26  ;;  %p3594_p2 = scmp.lt.s32.totalorder %s3588_s26, %s3588_s26 }
  0x8e   :  { %331 = vmatprep.subr.bf16.mxu1 %v3058_v12  ;;  %v3084_v12 = vld [vmem:[#allocation8 + $0x44] ss:$16 sps:$4 sm:$0xff]  }
  0x8f   :  { %874 = vmatprep.subr.bf16.mxu0 %v3084_v12  ;;  %p3595_p3 = por %p3594_p2, %p3593_p1 }
  0x91   :  { %332 = vmatpush1.bf16.msra.mxu1 %v3060_v14  ;;  %v3082_v14 = vld [vmem:[#allocation8 + $0x40] ss:$16 sps:$4 sm:$0xff]   ;;  %p3596_p4 = pnand %p3595_p3, %p3589_p0 }
  0x92   :  { %333 = vmatprep.subr.bf16.mxu1 %v3061_v15  ;;  %v3085_v15 = vld [vmem:[#allocation8 + $0x48] ss:$16 sps:$4 sm:$0xff]   ;;  %875 = vmatpush1.bf16.msra.mxu0 %v3082_v14 }
  0x95   :  { %334 = vmatpush1.bf16.msra.mxu1 %v3063_v16  ;;  %v3090_v16 = vld [vmem:[#allocation8 + $0x64] ss:$16 sps:$4 sm:$0xff]  }
  0x96   :  { %335 = vmatprep.subr.bf16.mxu1 %v3064_v17  ;;  %v3093_v17 = vld [vmem:[#allocation8 + $0x6c] ss:$16 sps:$4 sm:$0xff]   ;;  %876 = vmatprep.subr.bf16.mxu0 %v3090_v16 }
  0x99   :  { %336 = vmatpush1.bf16.msra.mxu1 %v3066_v18  ;;  %v3088_v18 = vld [vmem:[#allocation8 + $0x60] ss:$16 sps:$4 sm:$0xff]  }
  0x9a   :  { %337 = vmatprep.subr.bf16.mxu1 %v3067_v19  ;;  %v3091_v19 = vld [vmem:[#allocation8 + $0x68] ss:$16 sps:$4 sm:$0xff]   ;;  %877 = vmatpush1.bf16.msra.mxu0 %v3088_v18 }
  0x9d   :  { %338 = vmatpush1.bf16.msra.mxu1 %v3069_v20  ;;  %v3096_v20 = vld [vmem:[#allocation8 + $0x84] ss:$16 sps:$4 sm:$0xff]  }
  0x9e   :  { %911 = vmatprep.subr.bf16.mxu1 %v3075_v5  ;;  %878 = vmatprep.subr.bf16.mxu0 %v3096_v20  ;;  %v3162_v5 = vld [vmem:[#allocation8 + $0x1e4] ss:$16 sps:$4 sm:$0xff]  }
 0x156   :  { %v173_v21 = vpop.f32.mrb[0].mxu0 }
 0x157   :  { %v179_v22 = vrot.slane %v173_v21, 4  ;;  %v186_v23 = vmul.f32 %v173_v21, %v173_v21  ;;  %v3017_v24 = vpop.f32.mrb[1].mxu0 }
 0x158   :  { %v176_v25 = vpop.f32.mrb[2].mxu0  ;;  %v3102_v24 = vld [vmem:[#allocation8 + $0xa4] ss:$16 sps:$4 sm:$0xff]  }
 0x159   :  { %v180_v26 = vadd.f32 %v179_v22, %v173_v21  ;;  %v187_v27 = vrot.slane %v186_v23, 4  ;;  %v3018_v28 = vpop.f32.mrb[3].mxu0  ;;  %v3094_v22 = vld [vmem:[#allocation8 + $0x80] ss:$16 sps:$4 sm:$0xff]   ;;  %v3105_v25 = vld [vmem:[#allocation8 + $0xac] ss:$16 sps:$4 sm:$0xff]  }
 0x15a   :  { %879 = vmatpush1.bf16.msra.mxu0 %v3094_v22  ;;  %v3108_v28 = vld [vmem:[#allocation8 + $0xc4] ss:$16 sps:$4 sm:$0xff]  }
 0x15b   :  { %v181_v29 = vrot.slane %v180_v26, 2  ;;  %v188_v30 = vadd.f32 %v187_v27, %v186_v23  ;;  %v3097_v23 = vld [vmem:[#allocation8 + $0x88] ss:$16 sps:$4 sm:$0xff]   ;;  %880 = vmatprep.subr.bf16.mxu0 %v3102_v24 }
 0x15c   :  { %v3103_v27 = vld [vmem:[#allocation8 + $0xa8] ss:$16 sps:$4 sm:$0xff]  }
 0x15d   :  { %v182_v31 = vadd.f32 %v181_v29, %v180_v26  ;;  %v189_v32 = vrot.slane %v188_v30, 2  ;;  %v3100_v26 = vld [vmem:[#allocation8 + $0xa0] ss:$16 sps:$4 sm:$0xff]   ;;  %v3111_v29 = vld [vmem:[#allocation8 + $0xcc] ss:$16 sps:$4 sm:$0xff]  }
 0x15e   :  { %881 = vmatpush1.bf16.msra.mxu0 %v3100_v26 }
 0x15f   :  { %v183_v33 = vrot.slane %v182_v31, 1  ;;  %v190_v34 = vadd.f32 %v189_v32, %v188_v30  ;;  %v3106_v30 = vld [vmem:[#allocation8 + $0xc0] ss:$16 sps:$4 sm:$0xff]   ;;  %882 = vmatprep.subr.bf16.mxu0 %v3108_v28  ;;  %v3114_v32 = vld [vmem:[#allocation8 + $0xe4] ss:$16 sps:$4 sm:$0xff]  }
 0x161   :  { %v184_v35 = vadd.f32 %v183_v33, %v182_v31  ;;  %v191_v36 = vrot.slane %v190_v34, 1  ;;  %v3109_v31 = vld [vmem:[#allocation8 + $0xc8] ss:$16 sps:$4 sm:$0xff]   ;;  %v3117_v33 = vld [vmem:[#allocation8 + $0xec] ss:$16 sps:$4 sm:$0xff]  }
 0x162   :  { %883 = vmatpush1.bf16.msra.mxu0 %v3106_v30 }
 0x163   :  { %v185_v37 = vmul.f32 0.125, %v184_v35  ;;  %v192_v38 = vadd.f32 %v191_v36, %v190_v34  ;;  %v3112_v34 = vld [vmem:[#allocation8 + $0xe0] ss:$16 sps:$4 sm:$0xff]   ;;  %v3115_v35 = vld [vmem:[#allocation8 + $0xe8] ss:$16 sps:$4 sm:$0xff]   ;;  %884 = vmatprep.subr.bf16.mxu0 %v3114_v32 }
 0x164   :  { %v3120_v36 = vld [vmem:[#allocation8 + $0x104] ss:$16 sps:$4 sm:$0xff]  }
 0x165   :  { %v193_v39 = vmul.f32 0.125, %v192_v38  ;;  %v194_v40 = vmul.f32 %v185_v37, %v185_v37  ;;  %v3118_v38 = vld [vmem:[#allocation8 + $0x100] ss:$16 sps:$4 sm:$0xff]  }
 0x166   :  { %885 = vmatpush1.bf16.msra.mxu0 %v3112_v34 }
 0x167   :  { %v195_v41 = vsub.f32 %v193_v39, %v194_v40  ;;  %v3121_v39 = vld [vmem:[#allocation8 + $0x108] ss:$16 sps:$4 sm:$0xff]   ;;  %886 = vmatprep.subr.bf16.mxu0 %v3120_v36  ;;  %v3126_v40 = vld [vmem:[#allocation8 + $0x124] ss:$16 sps:$4 sm:$0xff]  }
 0x169   :  { %v196_v42 = vmax.f32 %v195_v41, 0.0  ;;  %v3129_v41 = vld [vmem:[#allocation8 + $0x12c] ss:$16 sps:$4 sm:$0xff]  }
 0x16a   :  { %887 = vmatpush1.bf16.msra.mxu0 %v3118_v38 }
 0x16b   :  { %v197_v43 = vadd.f32 1e-05, %v196_v42  ;;  %v3124_v42 = vld [vmem:[#allocation8 + $0x120] ss:$16 sps:$4 sm:$0xff]   ;;  %888 = vmatprep.subr.bf16.mxu0 %v3126_v40 }
 0x16d   :  { %3390 = vrsqrt.f32 %v197_v43  ;;  %v3127_v43 = vld [vmem:[#allocation8 + $0x128] ss:$16 sps:$4 sm:$0xff]  }
 0x16e   :  { %889 = vmatpush1.bf16.msra.mxu0 %v3124_v42 }
 0x16f   :  { %890 = vmatprep.subr.bf16.mxu0 %v3132_v44 }
 0x172   :  { %891 = vmatpush1.bf16.msra.mxu0 %v3130_v46 }
 0x177   :  { %v3391_v50 = vpop.eup %3390 }
 0x178   :  { %v199_v51 = vmul.f32 %v3391_v50, %v3779_v48  ;;  %v3136_v50 = vld [vmem:[#allocation8 + $0x160] ss:$16 sps:$4 sm:$0xff]  }
 0x17a   :  { %v200_v53 = vmul.f32 %v199_v51, %v185_v37  ;;  %v215_v57 = vrot.slane %v199_v51, %v3788_v54  ;;  %v3123_v37 = vld [vmem:[#allocation8 + $0x10c] ss:$16 sps:$4 sm:$0xff]   ;;  %v3138_v51 = vld [vmem:[#allocation8 + $0x164] ss:$16 sps:$4 sm:$0xff]  }
 0x17b   :  { %892 = vmatprep.subr.bf16.mxu0 %v3138_v51 }
 0x17c   :  { %v208_v55 = vrot.slane %v200_v53, %v3785_v52  ;;  %v216_v60 = vmul.f32 %v215_v57, %v173_v21  ;;  %v3099_v21 = vld [vmem:[#allocation8 + $0x8c] ss:$16 sps:$4 sm:$0xff]   ;;  %v3139_v53 = vld [vmem:[#allocation8 + $0x168] ss:$16 sps:$4 sm:$0xff]   ;;  %893 = vmatpush1.bf16.msra.mxu0 %v3136_v50 }
 0x17d   :  { %v3147_v57 = vld [vmem:[#allocation8 + $0x18c] ss:$16 sps:$4 sm:$0xff]  }
 0x17e   :  { %v209_v56 = vrot.slane %v208_v55, 7  ;;  %v3141_v55 = vld [vmem:[#allocation8 + $0x16c] ss:$16 sps:$4 sm:$0xff]  }
 0x180   :  { %v211_v59 = vsub.f32 %v3779_v48, %v209_v56  ;;  %v3144_v56 = vld [vmem:[#allocation8 + $0x184] ss:$16 sps:$4 sm:$0xff]  }
 0x181   :  { %894 = vmatprep.subr.bf16.mxu0 %v3144_v56 }
 0x182   :  { %v220_v61 = vrot.slane %v211_v59, %v3793_v58  ;;  %v3142_v59 = vld [vmem:[#allocation8 + $0x180] ss:$16 sps:$4 sm:$0xff]  }
 0x183   :  { %895 = vmatpush1.bf16.msra.mxu0 %v3142_v59 }
 0x184   :  { %v221_v62 = vadd.f32 %v220_v61, %v216_v60  ;;  %v3145_v60 = vld [vmem:[#allocation8 + $0x188] ss:$16 sps:$4 sm:$0xff]   ;;  %v3150_v61 = vld [vmem:[#allocation8 + $0x1a4] ss:$16 sps:$4 sm:$0xff]  }
 0x185   :  { %896 = vmatprep.subr.bf16.mxu0 %v3150_v61  ;;  %v3800_v61 = vsub.s32 2, %v3781_v49 }
 0x186   :  { %v222_v63 = vmul.f32 0.5, %v221_v62  ;;  %v3153_v62 = vld [vmem:[#allocation8 + $0x1ac] ss:$16 sps:$4 sm:$0xff]  }
 0x188   :  { %3392 = vtanh.f32 %v222_v63  ;;  %v3148_v63 = vld [vmem:[#allocation8 + $0x1a0] ss:$16 sps:$4 sm:$0xff]  }
 0x189   :  { %897 = vmatpush1.bf16.msra.mxu0 %v3148_v63 }
 0x192   :  { %v3393_v0 = vpop.eup %3392 }
 0x193   :  { %v224_v1 = vmul.f32 0.5, %v3393_v0  ;;  %v3151_v0 = vld [vmem:[#allocation8 + $0x1a8] ss:$16 sps:$4 sm:$0xff]  }
 0x195   :  { %v225_v2 = vadd.f32 0.5, %v224_v1  ;;  %v3156_v1 = vld [vmem:[#allocation8 + $0x1c4] ss:$16 sps:$4 sm:$0xff]  }
 0x196   :  { %898 = vmatprep.subr.bf16.mxu0 %v3156_v1 }
 0x197   :  { %v226_v3 = vpack.c.bf16 %v225_v2, %v225_v2  ;;  %v3159_v2 = vld [vmem:[#allocation8 + $0x1cc] ss:$16 sps:$4 sm:$0xff]  }
 0x199   :  { %356 = vmatmul.mubr.bf16.vlgmr.msra.gmra.mrb[0].mxu1 %v226_v3  ;;  %v3154_v3 = vld [vmem:[#allocation8 + $0x1c0] ss:$16 sps:$4 sm:$0xff]  }
 0x19a   :  { %912 = vmatpush1.bf16.msra.mxu1 %v3073_v7  ;;  %899 = vmatpush1.bf16.msra.mxu0 %v3154_v3  ;;  %v3160_v7 = vld [vmem:[#allocation8 + $0x1e0] ss:$16 sps:$4 sm:$0xff]  }
 0x19b   :  { %913 = vmatprep.subr.bf16.mxu1 %v3081_v9  ;;  %900 = vmatprep.subr.bf16.mxu0 %v3162_v5 }
 0x19e   :  { %914 = vmatpush1.bf16.msra.mxu1 %v3079_v11  ;;  %901 = vmatpush1.bf16.msra.mxu0 %v3160_v7 }
 0x19f   :  { %915 = vmatprep.subr.bf16.mxu1 %v3087_v13 }
 0x1a2   :  { %916 = vmatpush1.bf16.msra.mxu1 %v3085_v15 }
 0x1a3   :  { %917 = vmatprep.subr.bf16.mxu1 %v3093_v17 }
 0x1a6   :  { %918 = vmatpush1.bf16.msra.mxu1 %v3091_v19 }
 0x1a7   :  { %919 = vmatprep.subr.bf16.mxu1 %v3099_v21 }
 0x1aa   :  { %920 = vmatpush1.bf16.msra.mxu1 %v3097_v23 }
 0x1ab   :  { %921 = vmatprep.subr.bf16.mxu1 %v3105_v25 }
 0x1ae   :  { %922 = vmatpush1.bf16.msra.mxu1 %v3103_v27 }
 0x1af   :  { %923 = vmatprep.subr.bf16.mxu1 %v3111_v29 }
 0x1b2   :  { %924 = vmatpush1.bf16.msra.mxu1 %v3109_v31 }
 0x1b3   :  { %925 = vmatprep.subr.bf16.mxu1 %v3117_v33 }
 0x1b6   :  { %926 = vmatpush1.bf16.msra.mxu1 %v3115_v35 }
 0x1b7   :  { %927 = vmatprep.subr.bf16.mxu1 %v3123_v37 }
 0x1ba   :  { %928 = vmatpush1.bf16.msra.mxu1 %v3121_v39 }
 0x1bb   :  { %929 = vmatprep.subr.bf16.mxu1 %v3129_v41 }
 0x1be   :  { %930 = vmatpush1.bf16.msra.mxu1 %v3127_v43 }
 0x1bf   :  { %931 = vmatprep.subr.bf16.mxu1 %v3135_v45 }
 0x1c2   :  { %932 = vmatpush1.bf16.msra.mxu1 %v3133_v47 }
 0x1c3   :  { %933 = vmatprep.subr.bf16.mxu1 %v3141_v55 }
 0x1c6   :  { %934 = vmatpush1.bf16.msra.mxu1 %v3139_v53 }
 0x1c7   :  { %935 = vmatprep.subr.bf16.mxu1 %v3147_v57  ;;  %v405_v57 = vrot.slane %v3779_v48, 2 }
 0x1ca   :  { %936 = vmatpush1.bf16.msra.mxu1 %v3145_v60 }
 0x1cb   :  { %937 = vmatprep.subr.bf16.mxu1 %v3153_v62 }
 0x1ce   :  { %938 = vmatpush1.bf16.msra.mxu1 %v3151_v0 }
 0x1cf   :  { %939 = vmatprep.subr.bf16.mxu1 %v3159_v2 }
 0x1d2   :  { %940 = vmatpush1.bf16.msra.mxu1 %v3157_v4 }
 0x1d3   :  { %941 = vmatprep.subr.bf16.mxu1 %v3165_v6 }
 0x1d6   :  { %942 = vmatpush1.bf16.msra.mxu1 %v3163_v8 }
 0x26c   :  { %v357_v9 = vpop.f32.mrb[0].mxu1 }
 0x26d   :  { %v364_v10 = vrot.slane %v357_v9, 4  ;;  %v378_v11 = vmul.f32 %v357_v9, %v357_v9  ;;  %v359_v12 = vpop.f32.mrb[1].mxu1 }
 0x26e   :  { %v370_v13 = vrot.slane %v359_v12, 4  ;;  %v379_v14 = vmul.f32 %v359_v12, %v359_v12  ;;  %v361_v15 = vpop.f32.mrb[2].mxu1 }
 0x26f   :  { %v365_v16 = vadd.f32 %v364_v10, %v357_v9  ;;  %v380_v17 = vrot.slane %v378_v11, 4  ;;  %v362_v18 = vpop.f32.mrb[3].mxu1 }
 0x270   :  { %v371_v19 = vadd.f32 %v370_v13, %v359_v12  ;;  %v386_v20 = vrot.slane %v379_v14, 4 }
 0x271   :  { %v366_v21 = vrot.slane %v365_v16, 2  ;;  %v381_v22 = vadd.f32 %v380_v17, %v378_v11  ;;  %v3808_v11 = vsub.s32 3, %v3781_v49 }
 0x272   :  { %v372_v23 = vrot.slane %v371_v19, 2  ;;  %v387_v24 = vadd.f32 %v386_v20, %v379_v14 }
 0x273   :  { %v367_v25 = vadd.f32 %v366_v21, %v365_v16  ;;  %v382_v26 = vrot.slane %v381_v22, 2 }
 0x274   :  { %v373_v27 = vadd.f32 %v372_v23, %v371_v19  ;;  %v388_v28 = vrot.slane %v387_v24, 2 }
 0x275   :  { %v368_v29 = vrot.slane %v367_v25, 1  ;;  %v383_v30 = vadd.f32 %v382_v26, %v381_v22 }
 0x276   :  { %v374_v31 = vrot.slane %v373_v27, 1  ;;  %v389_v32 = vadd.f32 %v388_v28, %v387_v24  ;;  %v3168_v28 = vld [vmem:[#allocation10 + $0x4] ss:$16 sps:$4 sm:$0xff]  }
 0x277   :  { %v369_v33 = vadd.f32 %v368_v29, %v367_v25  ;;  %v384_v34 = vrot.slane %v383_v30, 1  ;;  %v3171_v29 = vld [vmem:[#allocation10 + $0xc] ss:$16 sps:$4 sm:$0xff]   ;;  %1959 = vmatprep.subr.bf16.mxu0 %v3168_v28 }
 0x278   :  { %v375_v35 = vadd.f32 %v374_v31, %v373_v27  ;;  %v390_v36 = vrot.slane %v389_v32, 1  ;;  %v3169_v31 = vld [vmem:[#allocation10 + $0x8] ss:$16 sps:$4 sm:$0xff]   ;;  %2041 = vmatprep.subr.bf16.mxu1 %v3171_v29  ;;  %v3255_v28 = vld [vmem:[#allocation10 + $0x1cc] ss:$16 sps:$4 sm:$0xff]  }
 0x279   :  { %v376_v37 = vmul.f32 0.125, %v369_v33  ;;  %v385_v38 = vadd.f32 %v384_v34, %v383_v30  ;;  %v3166_v30 = vld [vmem:[#allocation10] ss:$16 sps:$4 sm:$0xff]   ;;  %v3177_v33 = vld [vmem:[#allocation10 + $0x2c] ss:$16 sps:$4 sm:$0xff]  }
 0x27a   :  { %v377_v39 = vmul.f32 0.125, %v375_v35  ;;  %v391_v40 = vadd.f32 %v390_v36, %v389_v32  ;;  %v3174_v32 = vld [vmem:[#allocation10 + $0x24] ss:$16 sps:$4 sm:$0xff]   ;;  %v3172_v34 = vld [vmem:[#allocation10 + $0x20] ss:$16 sps:$4 sm:$0xff]  }
 0x27b   :  { %v392_v41 = vmul.f32 0.125, %v385_v38  ;;  %v394_v42 = vmul.f32 %v376_v37, %v376_v37  ;;  %v3175_v35 = vld [vmem:[#allocation10 + $0x28] ss:$16 sps:$4 sm:$0xff]   ;;  %v3180_v36 = vld [vmem:[#allocation10 + $0x44] ss:$16 sps:$4 sm:$0xff]  }
 0x27c   :  { %v393_v43 = vmul.f32 0.125, %v391_v40  ;;  %v395_v44 = vmul.f32 %v377_v39, %v377_v39  ;;  %v3178_v38 = vld [vmem:[#allocation10 + $0x40] ss:$16 sps:$4 sm:$0xff]   ;;  %v3186_v40 = vld [vmem:[#allocation10 + $0x64] ss:$16 sps:$4 sm:$0xff]  }
 0x27d   :  { %v396_v45 = vsub.f32 %v392_v41, %v394_v42  ;;  %v3189_v41 = vld [vmem:[#allocation10 + $0x6c] ss:$16 sps:$4 sm:$0xff]   ;;  %v3184_v42 = vld [vmem:[#allocation10 + $0x60] ss:$16 sps:$4 sm:$0xff]  }
 0x27e   :  { %v397_v46 = vsub.f32 %v393_v43, %v395_v44  ;;  %v3187_v43 = vld [vmem:[#allocation10 + $0x68] ss:$16 sps:$4 sm:$0xff]   ;;  %v3192_v44 = vld [vmem:[#allocation10 + $0x84] ss:$16 sps:$4 sm:$0xff]   ;;  %v3250_v29 = vld [vmem:[#allocation10 + $0x1c0] ss:$16 sps:$4 sm:$0xff]  }
 0x27f   :  { %v398_v47 = vmax.f32 %v396_v45, 0.0  ;;  %v3195_v45 = vld [vmem:[#allocation10 + $0x8c] ss:$16 sps:$4 sm:$0xff]  }
 0x280   :  { %v399_v50 = vmax.f32 %v397_v46, 0.0  ;;  %v3190_v46 = vld [vmem:[#allocation10 + $0x80] ss:$16 sps:$4 sm:$0xff]  }
 0x281   :  { %v400_v51 = vadd.f32 1e-05, %v398_v47  ;;  %v3193_v47 = vld [vmem:[#allocation10 + $0x88] ss:$16 sps:$4 sm:$0xff]  }
 0x282   :  { %v401_v53 = vadd.f32 1e-05, %v399_v50  ;;  %v3198_v50 = vld [vmem:[#allocation10 + $0xa4] ss:$16 sps:$4 sm:$0xff]  }
 0x283   :  { %3394 = vrsqrt.f32 %v400_v51  ;;  %v3201_v51 = vld [vmem:[#allocation10 + $0xac] ss:$16 sps:$4 sm:$0xff]  }
 0x284   :  { %3396 = vrsqrt.f32 %v401_v53  ;;  %v3196_v53 = vld [vmem:[#allocation10 + $0xa0] ss:$16 sps:$4 sm:$0xff]  }
 0x28d   :  { %v3395_v55 = vpop.eup %3394 }
 0x28e   :  { %v3397_v56 = vpop.eup %3396 }
 0x28f   :  { %v409_v59 = vcombine.low %v3395_v55, %v3397_v56  ;;  %v3199_v55 = vld [vmem:[#allocation10 + $0xa8] ss:$16 sps:$4 sm:$0xff]   ;;  %v3204_v56 = vld [vmem:[#allocation10 + $0xc4] ss:$16 sps:$4 sm:$0xff]  }
 0x291   :  { %v416_v60 = vrot.slane %v409_v59, %v3785_v52  ;;  %v3202_v59 = vld [vmem:[#allocation10 + $0xc0] ss:$16 sps:$4 sm:$0xff]  }
 0x293   :  { %v418_v62 = vmul.f32 %v416_v60, %v405_v57  ;;  %v3205_v60 = vld [vmem:[#allocation10 + $0xc8] ss:$16 sps:$4 sm:$0xff]  }
 0x295   :  { %v423_v63 = vrot.slane %v418_v62, %v3788_v54  ;;  %v427_v0 = vrot.slane %v418_v62, %v3800_v61  ;;  %v3210_v62 = vld [vmem:[#allocation10 + $0xe4] ss:$16 sps:$4 sm:$0xff]  }
 0x297   :  { %v430_v1 = vmul.f32 %v423_v63, %v376_v37  ;;  %v431_v2 = vmul.f32 %v427_v0, %v377_v39  ;;  %v448_v3 = vrot.slane %v423_v63, %v3788_v54  ;;  %v452_v4 = vrot.slane %v427_v0, %v3788_v54  ;;  %v3183_v37 = vld [vmem:[#allocation10 + $0x4c] ss:$16 sps:$4 sm:$0xff]   ;;  %v3181_v39 = vld [vmem:[#allocation10 + $0x48] ss:$16 sps:$4 sm:$0xff]   ;;  %v3208_v0 = vld [vmem:[#allocation10 + $0xe0] ss:$16 sps:$4 sm:$0xff]  }
 0x298   :  { %v3213_v63 = vld [vmem:[#allocation10 + $0xec] ss:$16 sps:$4 sm:$0xff]  }
 0x299   :  { %v434_v5 = vcombine.low %v430_v1, %v431_v2  ;;  %v454_v6 = vmul.f32 %v452_v4, %v359_v12  ;;  %v453_v7 = vmul.f32 %v448_v3, %v357_v9  ;;  %v3211_v1 = vld [vmem:[#allocation10 + $0xe8] ss:$16 sps:$4 sm:$0xff]   ;;  %v3216_v2 = vld [vmem:[#allocation10 + $0x104] ss:$16 sps:$4 sm:$0xff]   ;;  %v3219_v3 = vld [vmem:[#allocation10 + $0x10c] ss:$16 sps:$4 sm:$0xff]  }
 0x29a   :  { %v3214_v4 = vld [vmem:[#allocation10 + $0x100] ss:$16 sps:$4 sm:$0xff]  }
 0x29b   :  { %v441_v8 = vrot.slane %v434_v5, %v3785_v52  ;;  %v3217_v5 = vld [vmem:[#allocation10 + $0x108] ss:$16 sps:$4 sm:$0xff]  }
 0x29d   :  { %v442_v10 = vrot.slane %v441_v8, 7  ;;  %v3220_v8 = vld [vmem:[#allocation10 + $0x120] ss:$16 sps:$4 sm:$0xff]  }
 0x29f   :  { %v444_v13 = vsub.f32 %v405_v57, %v442_v10  ;;  %v3207_v57 = vld [vmem:[#allocation10 + $0xcc] ss:$16 sps:$4 sm:$0xff]   ;;  %v3223_v10 = vld [vmem:[#allocation10 + $0x128] ss:$16 sps:$4 sm:$0xff]  }
 0x2a1   :  { %v459_v14 = vrot.slane %v444_v13, %v3793_v58  ;;  %v463_v15 = vrot.slane %v444_v13, %v3808_v11  ;;  %v3228_v13 = vld [vmem:[#allocation10 + $0x144] ss:$16 sps:$4 sm:$0xff]  }
 0x2a3   :  { %v473_v16 = vrot.slane %v463_v15, %v3793_v58  ;;  %v469_v17 = vrot.slane %v459_v14, %v3793_v58  ;;  %v3231_v14 = vld [vmem:[#allocation10 + $0x14c] ss:$16 sps:$4 sm:$0xff]   ;;  %v3226_v15 = vld [vmem:[#allocation10 + $0x140] ss:$16 sps:$4 sm:$0xff]  }
 0x2a5   :  { %v475_v18 = vadd.f32 %v473_v16, %v454_v6  ;;  %v474_v19 = vadd.f32 %v469_v17, %v453_v7  ;;  %v3222_v6 = vld [vmem:[#allocation10 + $0x124] ss:$16 sps:$4 sm:$0xff]   ;;  %v3225_v7 = vld [vmem:[#allocation10 + $0x12c] ss:$16 sps:$4 sm:$0xff]   ;;  %v3229_v16 = vld [vmem:[#allocation10 + $0x148] ss:$16 sps:$4 sm:$0xff]  }
 0x2a6   :  { %v3232_v17 = vld [vmem:[#allocation10 + $0x160] ss:$16 sps:$4 sm:$0xff]  }
 0x2a7   :  { %v477_v20 = vmul.f32 0.5, %v475_v18  ;;  %v476_v12 = vmul.f32 0.5, %v474_v19  ;;  %v3234_v18 = vld [vmem:[#allocation10 + $0x164] ss:$16 sps:$4 sm:$0xff]   ;;  %v3235_v19 = vld [vmem:[#allocation10 + $0x168] ss:$16 sps:$4 sm:$0xff]  }
 0x2a9   :  { %3398 = vtanh.f32 %v477_v20  ;;  %v3237_v20 = vld [vmem:[#allocation10 + $0x16c] ss:$16 sps:$4 sm:$0xff]  }
 0x2aa   :  { %3400 = vtanh.f32 %v476_v12  ;;  %v3240_v12 = vld [vmem:[#allocation10 + $0x184] ss:$16 sps:$4 sm:$0xff]  }
 0x2b3   :  { %v3399_v9 = vpop.eup %3398 }
 0x2b4   :  { %v3401_v21 = vpop.eup %3400  ;;  %v481_v22 = vmul.f32 0.5, %v3399_v9  ;;  %v3243_v9 = vld [vmem:[#allocation10 + $0x18c] ss:$16 sps:$4 sm:$0xff]  }
 0x2b5   :  { %v480_v23 = vmul.f32 0.5, %v3401_v21  ;;  %v3238_v21 = vld [vmem:[#allocation10 + $0x180] ss:$16 sps:$4 sm:$0xff]  }
 0x2b6   :  { %v483_v24 = vadd.f32 0.5, %v481_v22  ;;  %v3241_v22 = vld [vmem:[#allocation10 + $0x188] ss:$16 sps:$4 sm:$0xff]  }
 0x2b7   :  { %v482_v25 = vadd.f32 0.5, %v480_v23  ;;  %v3246_v23 = vld [vmem:[#allocation10 + $0x1a4] ss:$16 sps:$4 sm:$0xff]  }
 0x2b8   :  { %v485_v26 = vpack.c.bf16 %v483_v24, %v483_v24  ;;  %v3249_v24 = vld [vmem:[#allocation10 + $0x1ac] ss:$16 sps:$4 sm:$0xff]  }
 0x2b9   :  { %v484_v27 = vpack.c.bf16 %v482_v25, %v482_v25  ;;  %v3244_v25 = vld [vmem:[#allocation10 + $0x1a0] ss:$16 sps:$4 sm:$0xff]  }
 0x2ba   :  { %902 = vmatprep.mubr.bf16.mxu0 %v485_v26  ;;  %943 = vmatprep.mubr.bf16.mxu1 %v485_v26  ;;  %v3247_v26 = vld [vmem:[#allocation10 + $0x1a8] ss:$16 sps:$4 sm:$0xff]  }
 0x2bb   :  { %903 = vmatmul.mubr.bf16.vlgmr.msra.gmra.mrb[4].mxu0 %v484_v27  ;;  %944 = vmatmul.mubr.bf16.vlgmr.msra.gmra.mrb[4].mxu1 %v484_v27  ;;  %v3252_v27 = vld [vmem:[#allocation10 + $0x1c4] ss:$16 sps:$4 sm:$0xff]  }
 0x2bc   :  { %1960 = vmatpush1.bf16.msra.mxu0 %v3166_v30  ;;  %2042 = vmatpush1.bf16.msra.mxu1 %v3169_v31  ;;  %v3253_v30 = vld [vmem:[#allocation10 + $0x1c8] ss:$16 sps:$4 sm:$0xff]   ;;  %v3258_v31 = vld [vmem:[#allocation10 + $0x1e4] ss:$16 sps:$4 sm:$0xff]  }
 0x2bd   :  { %1961 = vmatprep.subr.bf16.mxu0 %v3174_v32  ;;  %2043 = vmatprep.subr.bf16.mxu1 %v3177_v33  ;;  %v3261_v32 = vld [vmem:[#allocation10 + $0x1ec] ss:$16 sps:$4 sm:$0xff]   ;;  %v3256_v33 = vld [vmem:[#allocation10 + $0x1e0] ss:$16 sps:$4 sm:$0xff]  }
 0x2c0   :  { %1962 = vmatpush1.bf16.msra.mxu0 %v3172_v34  ;;  %2044 = vmatpush1.bf16.msra.mxu1 %v3175_v35  ;;  %v3259_v34 = vld [vmem:[#allocation10 + $0x1e8] ss:$16 sps:$4 sm:$0xff]   ;;  %v3264_v35 = vld [vmem:[#allocation10 + $0x204] ss:$16 sps:$4 sm:$0xff]  }
 0x2c1   :  { %1963 = vmatprep.subr.bf16.mxu0 %v3180_v36  ;;  %2045 = vmatprep.subr.bf16.mxu1 %v3183_v37  ;;  %v3267_v36 = vld [vmem:[#allocation10 + $0x20c] ss:$16 sps:$4 sm:$0xff]  }
 0x2c4   :  { %1964 = vmatpush1.bf16.msra.mxu0 %v3178_v38  ;;  %2046 = vmatpush1.bf16.msra.mxu1 %v3181_v39 }
 0x2c5   :  { %1965 = vmatprep.subr.bf16.mxu0 %v3186_v40  ;;  %2047 = vmatprep.subr.bf16.mxu1 %v3189_v41 }
 0x2c8   :  { %1966 = vmatpush1.bf16.msra.mxu0 %v3184_v42  ;;  %2048 = vmatpush1.bf16.msra.mxu1 %v3187_v43 }
 0x2c9   :  { %1967 = vmatprep.subr.bf16.mxu0 %v3192_v44  ;;  %2049 = vmatprep.subr.bf16.mxu1 %v3195_v45 }
 0x2cc   :  { %1968 = vmatpush1.bf16.msra.mxu0 %v3190_v46  ;;  %2050 = vmatpush1.bf16.msra.mxu1 %v3193_v47 }
 0x2cd   :  { %1969 = vmatprep.subr.bf16.mxu0 %v3198_v50  ;;  %2051 = vmatprep.subr.bf16.mxu1 %v3201_v51 }
 0x2d0   :  { %1970 = vmatpush1.bf16.msra.mxu0 %v3196_v53  ;;  %2052 = vmatpush1.bf16.msra.mxu1 %v3199_v55 }
 0x2d1   :  { %1971 = vmatprep.subr.bf16.mxu0 %v3204_v56  ;;  %2053 = vmatprep.subr.bf16.mxu1 %v3207_v57 }
 0x2d4   :  { %1972 = vmatpush1.bf16.msra.mxu0 %v3202_v59  ;;  %2054 = vmatpush1.bf16.msra.mxu1 %v3205_v60 }
 0x2d5   :  { %1973 = vmatprep.subr.bf16.mxu0 %v3210_v62  ;;  %2055 = vmatprep.subr.bf16.mxu1 %v3213_v63 }
 0x2d8   :  { %1974 = vmatpush1.bf16.msra.mxu0 %v3208_v0  ;;  %2056 = vmatpush1.bf16.msra.mxu1 %v3211_v1 }
 0x2d9   :  { %1975 = vmatprep.subr.bf16.mxu0 %v3216_v2  ;;  %2057 = vmatprep.subr.bf16.mxu1 %v3219_v3 }
 0x2dc   :  { %1976 = vmatpush1.bf16.msra.mxu0 %v3214_v4  ;;  %2058 = vmatpush1.bf16.msra.mxu1 %v3217_v5 }
 0x2dd   :  { %1977 = vmatprep.subr.bf16.mxu0 %v3222_v6  ;;  %2059 = vmatprep.subr.bf16.mxu1 %v3225_v7 }
 0x2e0   :  { %1978 = vmatpush1.bf16.msra.mxu0 %v3220_v8  ;;  %2060 = vmatpush1.bf16.msra.mxu1 %v3223_v10 }
 0x2e1   :  { %1979 = vmatprep.subr.bf16.mxu0 %v3228_v13  ;;  %2061 = vmatprep.subr.bf16.mxu1 %v3231_v14 }
 0x2e4   :  { %1980 = vmatpush1.bf16.msra.mxu0 %v3226_v15  ;;  %2062 = vmatpush1.bf16.msra.mxu1 %v3229_v16 }
 0x2e5   :  { %1981 = vmatprep.subr.bf16.mxu0 %v3234_v18  ;;  %2063 = vmatprep.subr.bf16.mxu1 %v3237_v20 }
 0x2e8   :  { %1982 = vmatpush1.bf16.msra.mxu0 %v3232_v17  ;;  %2064 = vmatpush1.bf16.msra.mxu1 %v3235_v19 }
 0x2e9   :  { %1983 = vmatprep.subr.bf16.mxu0 %v3240_v12  ;;  %2065 = vmatprep.subr.bf16.mxu1 %v3243_v9 }
 0x2ec   :  { %1984 = vmatpush1.bf16.msra.mxu0 %v3238_v21  ;;  %2066 = vmatpush1.bf16.msra.mxu1 %v3241_v22 }
 0x2ed   :  { %1985 = vmatprep.subr.bf16.mxu0 %v3246_v23  ;;  %2067 = vmatprep.subr.bf16.mxu1 %v3249_v24 }
 0x2f0   :  { %1986 = vmatpush1.bf16.msra.mxu0 %v3244_v25  ;;  %2068 = vmatpush1.bf16.msra.mxu1 %v3247_v26 }
 0x2f1   :  { %1987 = vmatprep.subr.bf16.mxu0 %v3252_v27  ;;  %2069 = vmatprep.subr.bf16.mxu1 %v3255_v28 }
 0x2f4   :  { %1988 = vmatpush1.bf16.msra.mxu0 %v3250_v29  ;;  %2070 = vmatpush1.bf16.msra.mxu1 %v3253_v30 }
 0x2f5   :  { %1989 = vmatprep.subr.bf16.mxu0 %v3258_v31  ;;  %2071 = vmatprep.subr.bf16.mxu1 %v3261_v32 }
 0x2f8   :  { %1990 = vmatpush1.bf16.msra.mxu0 %v3256_v33  ;;  %2072 = vmatpush1.bf16.msra.mxu1 %v3259_v34 }
 0x2f9   :  { %2000 = vmatprep.subr.bf16.mxu0 %v3264_v35  ;;  %2082 = vmatprep.subr.bf16.mxu1 %v3267_v36 }
 0x38e   :  { %v3814_v37 = vpop.f32.mrb[4].mxu0  ;;  %v3816_v38 = vpop.f32.mrb[4].mxu1 }
 0x38f   :  { %v952_v39 = vrot.slane %v3814_v37, 4  ;;  %v980_v40 = vmul.f32 %v3814_v37, %v3814_v37  ;;  %v964_v41 = vrot.slane %v3816_v38, 4  ;;  %v982_v42 = vmul.f32 %v3816_v38, %v3816_v38  ;;  %v3824_v43 = vpop.f32.mrb[5].mxu0  ;;  %v3826_v44 = vpop.f32.mrb[5].mxu1 }
 0x390   :  { %v958_v45 = vrot.slane %v3824_v43, 4  ;;  %v981_v46 = vmul.f32 %v3824_v43, %v3824_v43  ;;  %v970_v47 = vrot.slane %v3826_v44, 4  ;;  %v983_v50 = vmul.f32 %v3826_v44, %v3826_v44  ;;  %v908_v51 = vpop.f32.mrb[6].mxu0  ;;  %v949_v53 = vpop.f32.mrb[6].mxu1 }
 0x391   :  { %v953_v55 = vadd.f32 %v952_v39, %v3814_v37  ;;  %v984_v56 = vrot.slane %v980_v40, 4  ;;  %v965_v57 = vadd.f32 %v964_v41, %v3816_v38  ;;  %v996_v59 = vrot.slane %v982_v42, 4  ;;  %v909_v60 = vpop.f32.mrb[7].mxu0  ;;  %v950_v62 = vpop.f32.mrb[7].mxu1 }
 0x392   :  { %v959_v63 = vadd.f32 %v958_v45, %v3824_v43  ;;  %v990_v0 = vrot.slane %v981_v46, 4  ;;  %v971_v1 = vadd.f32 %v970_v47, %v3826_v44  ;;  %v1002_v2 = vrot.slane %v983_v50, 4 }
 0x393   :  { %v954_v3 = vrot.slane %v953_v55, 2  ;;  %v985_v4 = vadd.f32 %v984_v56, %v980_v40  ;;  %v966_v5 = vrot.slane %v965_v57, 2  ;;  %v997_v6 = vadd.f32 %v996_v59, %v982_v42 }
 0x394   :  { %v960_v7 = vrot.slane %v959_v63, 2  ;;  %v991_v8 = vadd.f32 %v990_v0, %v981_v46  ;;  %v972_v10 = vrot.slane %v971_v1, 2  ;;  %v1003_v13 = vadd.f32 %v1002_v2, %v983_v50 }
 0x395   :  { %v955_v14 = vadd.f32 %v954_v3, %v953_v55  ;;  %v986_v15 = vrot.slane %v985_v4, 2  ;;  %v967_v16 = vadd.f32 %v966_v5, %v965_v57  ;;  %v998_v17 = vrot.slane %v997_v6, 2 }
 0x396   :  { %v961_v18 = vadd.f32 %v960_v7, %v959_v63  ;;  %v992_v19 = vrot.slane %v991_v8, 2  ;;  %v973_v20 = vadd.f32 %v972_v10, %v971_v1  ;;  %v1004_v12 = vrot.slane %v1003_v13, 2 }
 0x397   :  { %v956_v9 = vrot.slane %v955_v14, 1  ;;  %v987_v21 = vadd.f32 %v986_v15, %v985_v4  ;;  %v968_v22 = vrot.slane %v967_v16, 1  ;;  %v999_v23 = vadd.f32 %v998_v17, %v997_v6 }
 0x398   :  { %v962_v24 = vrot.slane %v961_v18, 1  ;;  %v993_v25 = vadd.f32 %v992_v19, %v991_v8  ;;  %v974_v26 = vrot.slane %v973_v20, 1  ;;  %v1005_v27 = vadd.f32 %v1004_v12, %v1003_v13 }
 0x399   :  { %v957_v28 = vadd.f32 %v956_v9, %v955_v14  ;;  %v988_v29 = vrot.slane %v987_v21, 1  ;;  %v969_v30 = vadd.f32 %v968_v22, %v967_v16  ;;  %v1000_v31 = vrot.slane %v999_v23, 1  ;;  %v3838_v14 = vld [vmem:[#allocation11 + $0x8] sm:$0xff] }
 0x39a   :  { %v963_v32 = vadd.f32 %v962_v24, %v961_v18  ;;  %v994_v33 = vrot.slane %v993_v25, 1  ;;  %v975_v34 = vadd.f32 %v974_v26, %v973_v20  ;;  %v1006_v35 = vrot.slane %v1005_v27, 1 }
 0x39b   :  { %v976_v36 = vmul.f32 0.125, %v957_v28  ;;  %v989_v39 = vadd.f32 %v988_v29, %v987_v21  ;;  %v978_v40 = vmul.f32 0.125, %v969_v30  ;;  %v1001_v41 = vadd.f32 %v1000_v31, %v999_v23 }
 0x39c   :  { %v977_v42 = vmul.f32 0.125, %v963_v32  ;;  %v995_v45 = vadd.f32 %v994_v33, %v993_v25  ;;  %v979_v46 = vmul.f32 0.125, %v975_v34  ;;  %v1007_v47 = vadd.f32 %v1006_v35, %v1005_v27 }
 0x39d   :  { %v1008_v50 = vmul.f32 0.125, %v989_v39  ;;  %v1012_v51 = vmul.f32 %v976_v36, %v976_v36  ;;  %v1010_v53 = vmul.f32 0.125, %v1001_v41  ;;  %v1014_v55 = vmul.f32 %v978_v40, %v978_v40 }
 0x39e   :  { %v1009_v56 = vmul.f32 0.125, %v995_v45  ;;  %v1013_v57 = vmul.f32 %v977_v42, %v977_v42  ;;  %v1011_v59 = vmul.f32 0.125, %v1007_v47  ;;  %v1015_v60 = vmul.f32 %v979_v46, %v979_v46 }
 0x39f   :  { %v1016_v62 = vsub.f32 %v1008_v50, %v1012_v51  ;;  %v1018_v63 = vsub.f32 %v1010_v53, %v1014_v55  ;;  %v1033_v18 = vrot.slane %v3779_v48, 6  ;;  %v1034_v19 = vrot.slane %v3838_v14, 6 }
 0x3a0   :  { %v1017_v0 = vsub.f32 %v1009_v56, %v1013_v57  ;;  %v1019_v1 = vsub.f32 %v1011_v59, %v1015_v60  ;;  %v1072_v24 = vsub.s32 4, %v3781_v49  ;;  %v1076_v25 = vsub.s32 6, %v3781_v49 }
 0x3a1   :  { %v1020_v2 = vmax.f32 %v1016_v62, 0.0  ;;  %v1022_v3 = vmax.f32 %v1018_v63, 0.0  ;;  %v1036_v22 = vsel %vm1035_vm2, %v1033_v18, %v1034_v19  ;;  %v1145_v56 = vsub.s32 7, %v3781_v49 }
 0x3a2   :  { %v1021_v4 = vmax.f32 %v1017_v0, 0.0  ;;  %v1023_v5 = vmax.f32 %v1019_v1, 0.0  ;;  %v1141_v57 = vsub.s32 5, %v3781_v49 }
 0x3a3   :  { %v1024_v6 = vadd.f32 1e-05, %v1020_v2  ;;  %v1026_v7 = vadd.f32 1e-05, %v1022_v3 }
 0x3a4   :  { %v1025_v8 = vadd.f32 1e-05, %v1021_v4  ;;  %v1027_v10 = vadd.f32 1e-05, %v1023_v5 }
 0x3a5   :  { %3402 = vrsqrt.f32 %v1024_v6 }
 0x3a6   :  { %3404 = vrsqrt.f32 %v1026_v7 }
 0x3a7   :  { %3406 = vrsqrt.f32 %v1025_v8 }
 0x3a8   :  { %3408 = vrsqrt.f32 %v1027_v10 }
 0x3af   :  { %v3403_v13 = vpop.eup %3402 }
 0x3b0   :  { %v3405_v15 = vpop.eup %3404 }
 0x3b1   :  { %v3407_v16 = vpop.eup %3406 }
 0x3b2   :  { %v3409_v17 = vpop.eup %3408  ;;  %v1042_v20 = vcombine.low %v3403_v13, %v3407_v16 }
 0x3b3   :  { %v1043_v12 = vcombine.low %v3405_v15, %v3409_v17 }
 0x3b4   :  { %v1050_v9 = vrot.slane %v1042_v20, %v3785_v52 }
 0x3b5   :  { %v1057_v21 = vrot.slane %v1043_v12, %v3785_v52 }
 0x3b7   :  { %v1058_v23 = vcombine.low %v1050_v9, %v1057_v21  ;;  %v3262_v9 = vld [vmem:[#allocation10 + $0x200] ss:$16 sps:$4 sm:$0xff]   ;;  %v3265_v21 = vld [vmem:[#allocation10 + $0x208] ss:$16 sps:$4 sm:$0xff]  }
 0x3b9   :  { %v1060_v26 = vmul.f32 %v1058_v23, %v1036_v22 }
 0x3bb   :  { %v1065_v48 = vrot.slane %v1060_v26, %v3788_v54  ;;  %v1069_v27 = vrot.slane %v1060_v26, %v3800_v61  ;;  %v1073_v28 = vrot.slane %v1060_v26, %v1072_v24  ;;  %v1077_v29 = vrot.slane %v1060_v26, %v1076_v25  ;;  %v3270_v26 = vld [vmem:[#allocation10 + $0x224] ss:$16 sps:$4 sm:$0xff]  }
 0x3bd   :  { %v1082_v30 = vmul.f32 %v1065_v48, %v976_v36  ;;  %v1083_v31 = vmul.f32 %v1069_v27, %v977_v42  ;;  %v1084_v32 = vmul.f32 %v1073_v28, %v978_v40  ;;  %v1085_v33 = vmul.f32 %v1077_v29, %v979_v46 }
 0x3be   :  { %v1125_v34 = vrot.slane %v1077_v29, %v3788_v54  ;;  %v1117_v35 = vrot.slane %v1069_v27, %v3788_v54  ;;  %v1113_v39 = vrot.slane %v1065_v48, %v3788_v54  ;;  %v1121_v41 = vrot.slane %v1073_v28, %v3788_v54  ;;  %v3273_v48 = vld [vmem:[#allocation10 + $0x22c] ss:$16 sps:$4 sm:$0xff]   ;;  %v3268_v28 = vld [vmem:[#allocation10 + $0x220] ss:$16 sps:$4 sm:$0xff]   ;;  %v3271_v29 = vld [vmem:[#allocation10 + $0x228] ss:$16 sps:$4 sm:$0xff]  }
 0x3bf   :  { %v1090_v45 = vcombine.low %v1082_v30, %v1083_v31  ;;  %v1091_v47 = vcombine.low %v1084_v32, %v1085_v33  ;;  %v3276_v30 = vld [vmem:[#allocation10 + $0x244] ss:$16 sps:$4 sm:$0xff]   ;;  %v3279_v31 = vld [vmem:[#allocation10 + $0x24c] ss:$16 sps:$4 sm:$0xff]   ;;  %v3274_v32 = vld [vmem:[#allocation10 + $0x240] ss:$16 sps:$4 sm:$0xff]  }
 0x3c0   :  { %v1129_v50 = vmul.f32 %v1125_v34, %v3826_v44  ;;  %v1127_v51 = vmul.f32 %v1117_v35, %v3824_v43  ;;  %v1126_v53 = vmul.f32 %v1113_v39, %v3814_v37  ;;  %v1128_v36 = vmul.f32 %v1121_v41, %v3816_v38  ;;  %v3277_v33 = vld [vmem:[#allocation10 + $0x248] ss:$16 sps:$4 sm:$0xff]   ;;  %v3282_v34 = vld [vmem:[#allocation10 + $0x264] ss:$16 sps:$4 sm:$0xff]   ;;  %v3285_v35 = vld [vmem:[#allocation10 + $0x26c] ss:$16 sps:$4 sm:$0xff]  }
 0x3c1   :  { %v1098_v40 = vrot.slane %v1090_v45, %v3785_v52  ;;  %v1105_v42 = vrot.slane %v1091_v47, %v3785_v52  ;;  %v3280_v39 = vld [vmem:[#allocation10 + $0x260] ss:$16 sps:$4 sm:$0xff]   ;;  %v3283_v41 = vld [vmem:[#allocation10 + $0x268] ss:$16 sps:$4 sm:$0xff]   ;;  %v3288_v45 = vld [vmem:[#allocation10 + $0x284] ss:$16 sps:$4 sm:$0xff]  }
 0x3c2   :  { %v3291_v47 = vld [vmem:[#allocation10 + $0x28c] ss:$16 sps:$4 sm:$0xff]  }
 0x3c3   :  { %v1106_v46 = vcombine.low %v1098_v40, %v1105_v42  ;;  %v3292_v40 = vld [vmem:[#allocation10 + $0x2a0] ss:$16 sps:$4 sm:$0xff]   ;;  %v3295_v42 = vld [vmem:[#allocation10 + $0x2a8] ss:$16 sps:$4 sm:$0xff]  }
 0x3c5   :  { %v1107_v55 = vrot.slane %v1106_v46, 7  ;;  %v3300_v46 = vld [vmem:[#allocation10 + $0x2c4] ss:$16 sps:$4 sm:$0xff]  }
 0x3c7   :  { %v1109_v59 = vsub.f32 %v1036_v22, %v1107_v55  ;;  %v3303_v55 = vld [vmem:[#allocation10 + $0x2cc] ss:$16 sps:$4 sm:$0xff]  }
 0x3c9   :  { %v1146_v44 = vrot.slane %v1109_v59, %v1145_v56  ;;  %v1138_v43 = vrot.slane %v1109_v59, %v3808_v11  ;;  %v1134_v37 = vrot.slane %v1109_v59, %v3793_v58  ;;  %v1142_v38 = vrot.slane %v1109_v59, %v1141_v57  ;;  %v3298_v59 = vld [vmem:[#allocation10 + $0x2c0] ss:$16 sps:$4 sm:$0xff]  }
 0x3cb   :  { %v1166_v60 = vrot.slane %v1146_v44, %v3793_v58  ;;  %v1158_v62 = vrot.slane %v1138_v43, %v3793_v58  ;;  %v1154_v63 = vrot.slane %v1134_v37, %v3793_v58  ;;  %v1162_v0 = vrot.slane %v1142_v38, %v3793_v58  ;;  %v3301_v44 = vld [vmem:[#allocation10 + $0x2c8] ss:$16 sps:$4 sm:$0xff]   ;;  %v3306_v43 = vld [vmem:[#allocation10 + $0x2e4] ss:$16 sps:$4 sm:$0xff]   ;;  %v3309_v37 = vld [vmem:[#allocation10 + $0x2ec] ss:$16 sps:$4 sm:$0xff]  }
 0x3cc   :  { %v3304_v38 = vld [vmem:[#allocation10 + $0x2e0] ss:$16 sps:$4 sm:$0xff]  }
 0x3cd   :  { %v1170_v1 = vadd.f32 %v1166_v60, %v1129_v50  ;;  %v1168_v2 = vadd.f32 %v1158_v62, %v1127_v51  ;;  %v1167_v3 = vadd.f32 %v1154_v63, %v1126_v53  ;;  %v3877_v4 = vadd.f32 %v1162_v0, %v1128_v36  ;;  %v3286_v50 = vld [vmem:[#allocation10 + $0x280] ss:$16 sps:$4 sm:$0xff]   ;;  %v3289_v51 = vld [vmem:[#allocation10 + $0x288] ss:$16 sps:$4 sm:$0xff]   ;;  %v3294_v53 = vld [vmem:[#allocation10 + $0x2a4] ss:$16 sps:$4 sm:$0xff]  }
 0x3ce   :  { %v3297_v36 = vld [vmem:[#allocation10 + $0x2ac] ss:$16 sps:$4 sm:$0xff]   ;;  %v3307_v60 = vld [vmem:[#allocation10 + $0x2e8] ss:$16 sps:$4 sm:$0xff]   ;;  %v3312_v62 = vld [vmem:[#allocation10 + $0x304] ss:$16 sps:$4 sm:$0xff]  }
 0x3cf   :  { %v1172_v5 = vmul.f32 0.5, %v1168_v2  ;;  %v1171_v6 = vmul.f32 0.5, %v1167_v3  ;;  %v1174_v7 = vmul.f32 0.5, %v1170_v1  ;;  %v3315_v63 = vld [vmem:[#allocation10 + $0x30c] ss:$16 sps:$4 sm:$0xff]  }
 0x3d0   :  { %v3310_v0 = vld [vmem:[#allocation10 + $0x300] ss:$16 sps:$4 sm:$0xff]   ;;  %v3313_v1 = vld [vmem:[#allocation10 + $0x308] ss:$16 sps:$4 sm:$0xff]   ;;  %v3318_v2 = vld [vmem:[#allocation10 + $0x324] ss:$16 sps:$4 sm:$0xff]  }
 0x3d1   :  { %3410 = vtanh.f32 %v1172_v5  ;;  %v3321_v3 = vld [vmem:[#allocation10 + $0x32c] ss:$16 sps:$4 sm:$0xff]   ;;  %v3316_v5 = vld [vmem:[#allocation10 + $0x320] ss:$16 sps:$4 sm:$0xff]  }
 0x3d2   :  { %3412 = vtanh.f32 %v1171_v6  ;;  %v3319_v6 = vld [vmem:[#allocation10 + $0x328] ss:$16 sps:$4 sm:$0xff]  }
 0x3d3   :  { %3414 = vtanh.f32 %v1174_v7  ;;  %v3324_v7 = vld [vmem:[#allocation10 + $0x344] ss:$16 sps:$4 sm:$0xff]  }
 0x3db   :  { %v3411_v8 = vpop.eup %3410 }
 0x3dc   :  { %v3413_v10 = vpop.eup %3412  ;;  %v1180_v13 = vmul.f32 0.5, %v3411_v8  ;;  %v3327_v8 = vld [vmem:[#allocation10 + $0x34c] ss:$16 sps:$4 sm:$0xff]  }
 0x3dd   :  { %v3415_v15 = vpop.eup %3414  ;;  %v1179_v16 = vmul.f32 0.5, %v3413_v10  ;;  %v3322_v10 = vld [vmem:[#allocation10 + $0x340] ss:$16 sps:$4 sm:$0xff]  }
 0x3de   :  { %v1184_v17 = vadd.f32 0.5, %v1180_v13  ;;  %v1182_v18 = vmul.f32 0.5, %v3415_v15  ;;  %v3325_v13 = vld [vmem:[#allocation10 + $0x348] ss:$16 sps:$4 sm:$0xff]   ;;  %v1173_v15 = vmul.f32 0.5, %v3877_v4 }
 0x3df   :  { %v1183_v20 = vadd.f32 0.5, %v1179_v16  ;;  %v3330_v16 = vld [vmem:[#allocation10 + $0x364] ss:$16 sps:$4 sm:$0xff]  }
 0x3e0   :  { %v1188_v12 = vpack.c.bf16 %v1184_v17, %v1184_v17  ;;  %v1186_v22 = vadd.f32 0.5, %v1182_v18  ;;  %v3333_v17 = vld [vmem:[#allocation10 + $0x36c] ss:$16 sps:$4 sm:$0xff]   ;;  %v3328_v18 = vld [vmem:[#allocation10 + $0x360] ss:$16 sps:$4 sm:$0xff]   ;;  %3416 = vtanh.f32 %v1173_v15 }
 0x3e1   :  { %v1187_v23 = vpack.c.bf16 %v1183_v20, %v1183_v20  ;;  %v3331_v20 = vld [vmem:[#allocation10 + $0x368] ss:$16 sps:$4 sm:$0xff]   ;;  %v3342_v4 = vld [vmem:[#allocation10 + $0x3a4] ss:$16 sps:$4 sm:$0xff]  }
 0x3e2   :  { %1991 = vmatprep.mubr.bf16.mxu0 %v1188_v12  ;;  %2073 = vmatprep.mubr.bf16.mxu1 %v1188_v12  ;;  %v1190_v27 = vpack.c.bf16 %v1186_v22, %v1186_v22  ;;  %v3336_v12 = vld [vmem:[#allocation10 + $0x384] ss:$16 sps:$4 sm:$0xff]   ;;  %v3337_v22 = vld [vmem:[#allocation10 + $0x388] ss:$16 sps:$4 sm:$0xff]  }
 0x3e3   :  { %1992 = vmatmul.mubr.bf16.vlgmr.msra.gmra.mrb[8].mxu0 %v1187_v23  ;;  %2074 = vmatmul.mubr.bf16.vlgmr.msra.gmra.mrb[8].mxu1 %v1187_v23  ;;  %v3345_v23 = vld [vmem:[#allocation10 + $0x3ac] ss:$16 sps:$4 sm:$0xff]  }
 0x3e4   :  { %2001 = vmatpush1.bf16.msra.mxu0 %v3262_v9  ;;  %2083 = vmatpush1.bf16.msra.mxu1 %v3265_v21  ;;  %v3339_v9 = vld [vmem:[#allocation10 + $0x38c] ss:$16 sps:$4 sm:$0xff]   ;;  %v3334_v21 = vld [vmem:[#allocation10 + $0x380] ss:$16 sps:$4 sm:$0xff]  }
 0x3e5   :  { %2032 = vmatprep.mubr.bf16.mxu0 %v1190_v27  ;;  %2114 = vmatprep.mubr.bf16.mxu1 %v1190_v27  ;;  %v3348_v27 = vld [vmem:[#allocation10 + $0x3c4] ss:$16 sps:$4 sm:$0xff]  }
 0x3e6   :  { %2002 = vmatprep.subr.bf16.mxu0 %v3270_v26  ;;  %2084 = vmatprep.subr.bf16.mxu1 %v3273_v48  ;;  %v3340_v26 = vld [vmem:[#allocation10 + $0x3a0] ss:$16 sps:$4 sm:$0xff]   ;;  %v3343_v48 = vld [vmem:[#allocation10 + $0x3a8] ss:$16 sps:$4 sm:$0xff]  }
 0x3e7   :  { %v3385_v15 = vld [vmem:[#allocation13 + $0xb0] sm:$0xff]  }
 0x3e8   :  { %2003 = vmatpush1.bf16.msra.mxu0 %v3268_v28  ;;  %2085 = vmatpush1.bf16.msra.mxu1 %v3271_v29  ;;  %v3351_v28 = vld [vmem:[#allocation10 + $0x3cc] ss:$16 sps:$4 sm:$0xff]  }
 0x3e9   :  { %2004 = vmatprep.subr.bf16.mxu0 %v3276_v30  ;;  %2086 = vmatprep.subr.bf16.mxu1 %v3279_v31  ;;  %v3346_v30 = vld [vmem:[#allocation10 + $0x3c0] ss:$16 sps:$4 sm:$0xff]   ;;  %v3349_v31 = vld [vmem:[#allocation10 + $0x3c8] ss:$16 sps:$4 sm:$0xff]  }
 0x3ea   :  { %v3417_v29 = vpop.eup %3416 }
 0x3ec   :  { %2005 = vmatpush1.bf16.msra.mxu0 %v3274_v32  ;;  %2087 = vmatpush1.bf16.msra.mxu1 %v3277_v33  ;;  %v3354_v32 = vld [vmem:[#allocation10 + $0x3e4] ss:$16 sps:$4 sm:$0xff]   ;;  %v3357_v33 = vld [vmem:[#allocation10 + $0x3ec] ss:$16 sps:$4 sm:$0xff]  }
 0x3ed   :  { %2006 = vmatprep.subr.bf16.mxu0 %v3282_v34  ;;  %2088 = vmatprep.subr.bf16.mxu1 %v3285_v35  ;;  %v1181_v34 = vmul.f32 0.5, %v3417_v29  ;;  %v3352_v35 = vld [vmem:[#allocation10 + $0x3e0] ss:$16 sps:$4 sm:$0xff]  }
 0x3f0   :  { %2007 = vmatpush1.bf16.msra.mxu0 %v3280_v39  ;;  %2089 = vmatpush1.bf16.msra.mxu1 %v3283_v41  ;;  %v3355_v39 = vld [vmem:[#allocation10 + $0x3e8] ss:$16 sps:$4 sm:$0xff]   ;;  %v1185_v41 = vadd.f32 0.5, %v1181_v34 }
 0x3f1   :  { %2008 = vmatprep.subr.bf16.mxu0 %v3288_v45  ;;  %2090 = vmatprep.subr.bf16.mxu1 %v3291_v47  ;;  %v3358_v47 = vld [vmem:[#allocation13 + $0x40] sm:$0xff]  }
 0x3f2   :  { %v1189_v45 = vpack.c.bf16 %v1185_v41, %v1185_v41 }
 0x3f4   :  { %2009 = vmatpush1.bf16.msra.mxu0 %v3286_v50  ;;  %2091 = vmatpush1.bf16.msra.mxu1 %v3289_v51  ;;  %v3359_v50 = vld [vmem:[#allocation13 + $0xc0] sm:$0xff]  }
 0x3f5   :  { %2010 = vmatprep.subr.bf16.mxu0 %v3294_v53  ;;  %2092 = vmatprep.subr.bf16.mxu1 %v3297_v36  ;;  %v3360_v51 = vld [vmem:[#allocation13] sm:$0xff]   ;;  %v3362_v36 = vld [vmem:[#allocation13 + $0x48] sm:$0xff]  }
 0x3f6   :  { %v3361_v53 = vld [vmem:[#allocation13 + $0x80] sm:$0xff]  }
 0x3f8   :  { %2011 = vmatpush1.bf16.msra.mxu0 %v3292_v40  ;;  %2093 = vmatpush1.bf16.msra.mxu1 %v3295_v42  ;;  %v3363_v40 = vld [vmem:[#allocation13 + $0xc8] sm:$0xff]  }
 0x3f9   :  { %2012 = vmatprep.subr.bf16.mxu0 %v3300_v46  ;;  %2094 = vmatprep.subr.bf16.mxu1 %v3303_v55  ;;  %v3364_v42 = vld [vmem:[#allocation13 + $0x8] sm:$0xff]   ;;  %v3366_v55 = vld [vmem:[#allocation13 + $0x50] sm:$0xff]  }
 0x3fa   :  { %v3365_v46 = vld [vmem:[#allocation13 + $0x88] sm:$0xff]  }
 0x3fc   :  { %2013 = vmatpush1.bf16.msra.mxu0 %v3298_v59  ;;  %2095 = vmatpush1.bf16.msra.mxu1 %v3301_v44  ;;  %v3367_v59 = vld [vmem:[#allocation13 + $0xd0] sm:$0xff]  }
 0x3fd   :  { %2014 = vmatprep.subr.bf16.mxu0 %v3306_v43  ;;  %2096 = vmatprep.subr.bf16.mxu1 %v3309_v37  ;;  %v3368_v44 = vld [vmem:[#allocation13 + $0x10] sm:$0xff]   ;;  %v3370_v37 = vld [vmem:[#allocation13 + $0x58] sm:$0xff]  }
 0x3fe   :  { %v3369_v43 = vld [vmem:[#allocation13 + $0x90] sm:$0xff]  }
 0x400   :  { %2015 = vmatpush1.bf16.msra.mxu0 %v3304_v38  ;;  %2097 = vmatpush1.bf16.msra.mxu1 %v3307_v60  ;;  %v3371_v38 = vld [vmem:[#allocation13 + $0xd8] sm:$0xff]  }
 0x401   :  { %2016 = vmatprep.subr.bf16.mxu0 %v3312_v62  ;;  %2098 = vmatprep.subr.bf16.mxu1 %v3315_v63  ;;  %v3372_v60 = vld [vmem:[#allocation13 + $0x18] sm:$0xff]   ;;  %v3374_v63 = vld [vmem:[#allocation13 + $0x60] sm:$0xff]  }
 0x402   :  { %v3373_v62 = vld [vmem:[#allocation13 + $0x98] sm:$0xff]  }
 0x404   :  { %2017 = vmatpush1.bf16.msra.mxu0 %v3310_v0  ;;  %2099 = vmatpush1.bf16.msra.mxu1 %v3313_v1  ;;  %v3375_v0 = vld [vmem:[#allocation13 + $0xe0] sm:$0xff]  }
 0x405   :  { %2018 = vmatprep.subr.bf16.mxu0 %v3318_v2  ;;  %2100 = vmatprep.subr.bf16.mxu1 %v3321_v3  ;;  %v3376_v1 = vld [vmem:[#allocation13 + $0x20] sm:$0xff]   ;;  %v3378_v3 = vld [vmem:[#allocation13 + $0x68] sm:$0xff]  }
 0x406   :  { %v3377_v2 = vld [vmem:[#allocation13 + $0xa0] sm:$0xff]  }
 0x408   :  { %2019 = vmatpush1.bf16.msra.mxu0 %v3316_v5  ;;  %2101 = vmatpush1.bf16.msra.mxu1 %v3319_v6  ;;  %v3379_v5 = vld [vmem:[#allocation13 + $0xe8] sm:$0xff]  }
 0x409   :  { %2020 = vmatprep.subr.bf16.mxu0 %v3324_v7  ;;  %2102 = vmatprep.subr.bf16.mxu1 %v3327_v8  ;;  %v3380_v6 = vld [vmem:[#allocation13 + $0x28] sm:$0xff]   ;;  %v3382_v8 = vld [vmem:[#allocation13 + $0x70] sm:$0xff]  }
 0x40a   :  { %v3381_v7 = vld [vmem:[#allocation13 + $0xa8] sm:$0xff]  }
 0x40c   :  { %2021 = vmatpush1.bf16.msra.mxu0 %v3322_v10  ;;  %2103 = vmatpush1.bf16.msra.mxu1 %v3325_v13  ;;  %v3383_v10 = vld [vmem:[#allocation13 + $0xf0] sm:$0xff]  }
 0x40d   :  { %2022 = vmatprep.subr.bf16.mxu0 %v3330_v16  ;;  %2104 = vmatprep.subr.bf16.mxu1 %v3333_v17  ;;  %v3384_v13 = vld [vmem:[#allocation13 + $0x30] sm:$0xff]   ;;  %v3386_v16 = vld [vmem:[#allocation13 + $0x78] sm:$0xff]  }
 0x40e   :  { %v3387_v17 = vld [vmem:[#allocation13 + $0xf8] sm:$0xff]  }
 0x410   :  { %2023 = vmatpush1.bf16.msra.mxu0 %v3328_v18  ;;  %2105 = vmatpush1.bf16.msra.mxu1 %v3331_v20  ;;  %v3388_v18 = vld [vmem:[#allocation13 + $0x38] sm:$0xff]  }
 0x411   :  { %2024 = vmatprep.subr.bf16.mxu0 %v3336_v12  ;;  %2106 = vmatprep.subr.bf16.mxu1 %v3339_v9  ;;  %v3389_v20 = vld [vmem:[#allocation13 + $0xb8] sm:$0xff]  }
 0x414   :  { %2025 = vmatpush1.bf16.msra.mxu0 %v3334_v21  ;;  %2107 = vmatpush1.bf16.msra.mxu1 %v3337_v22 }
 0x415   :  { %2026 = vmatprep.subr.bf16.mxu0 %v3342_v4  ;;  %2108 = vmatprep.subr.bf16.mxu1 %v3345_v23 }
 0x418   :  { %2027 = vmatpush1.bf16.msra.mxu0 %v3340_v26  ;;  %2109 = vmatpush1.bf16.msra.mxu1 %v3343_v48 }
 0x419   :  { %2028 = vmatprep.subr.bf16.mxu0 %v3348_v27  ;;  %2110 = vmatprep.subr.bf16.mxu1 %v3351_v28 }
 0x41c   :  { %2029 = vmatpush1.bf16.msra.mxu0 %v3346_v30  ;;  %2111 = vmatpush1.bf16.msra.mxu1 %v3349_v31 }
 0x41d   :  { %2030 = vmatprep.subr.bf16.mxu0 %v3354_v32  ;;  %2112 = vmatprep.subr.bf16.mxu1 %v3357_v33 }
 0x420   :  { %2031 = vmatpush1.bf16.msra.mxu0 %v3352_v35  ;;  %2113 = vmatpush1.bf16.msra.mxu1 %v3355_v39 }
 0x421   :  { %2969 = vmatprep.subr.bf16.mxu0 %v3358_v47  ;;  %2991 = vmatprep.subr.bf16.mxu1 %v3359_v50 }
 0x423   :  { %2033 = vmatmul.mubr.bf16.vlgmr.msra.gmra.mrb[8].mxu0 %v1189_v45  ;;  %2115 = vmatmul.mubr.bf16.vlgmr.msra.gmra.mrb[8].mxu1 %v1189_v45 }
 0x424   :  { %2970 = vmatpush3.bf16.msra.mxu0 %v3360_v51  ;;  %2992 = vmatpush3.bf16.msra.mxu1 %v3361_v53 }
 0x425   :  { %2971 = vmatprep.subr.bf16.mxu0 %v3362_v36  ;;  %2993 = vmatprep.subr.bf16.mxu1 %v3363_v40 }
 0x428   :  { %2972 = vmatpush3.bf16.msra.mxu0 %v3364_v42  ;;  %2994 = vmatpush3.bf16.msra.mxu1 %v3365_v46 }
 0x429   :  { %2973 = vmatprep.subr.bf16.mxu0 %v3366_v55  ;;  %2995 = vmatprep.subr.bf16.mxu1 %v3367_v59 }
 0x42c   :  { %2974 = vmatpush3.bf16.msra.mxu0 %v3368_v44  ;;  %2996 = vmatpush3.bf16.msra.mxu1 %v3369_v43 }
 0x42d   :  { %2975 = vmatprep.subr.bf16.mxu0 %v3370_v37  ;;  %2997 = vmatprep.subr.bf16.mxu1 %v3371_v38 }
 0x430   :  { %2976 = vmatpush3.bf16.msra.mxu0 %v3372_v60  ;;  %2998 = vmatpush3.bf16.msra.mxu1 %v3373_v62 }
 0x431   :  { %2977 = vmatprep.subr.bf16.mxu0 %v3374_v63  ;;  %2999 = vmatprep.subr.bf16.mxu1 %v3375_v0 }
 0x434   :  { %2978 = vmatpush3.bf16.msra.mxu0 %v3376_v1  ;;  %3000 = vmatpush3.bf16.msra.mxu1 %v3377_v2 }
 0x435   :  { %2979 = vmatprep.subr.bf16.mxu0 %v3378_v3  ;;  %3001 = vmatprep.subr.bf16.mxu1 %v3379_v5 }
 0x438   :  { %2980 = vmatpush3.bf16.msra.mxu0 %v3380_v6  ;;  %3002 = vmatpush3.bf16.msra.mxu1 %v3381_v7 }
 0x439   :  { %2981 = vmatprep.subr.bf16.mxu0 %v3382_v8  ;;  %3003 = vmatprep.subr.bf16.mxu1 %v3383_v10 }
 0x43c   :  { %2982 = vmatpush3.bf16.msra.mxu0 %v3384_v13  ;;  %3004 = vmatpush3.bf16.msra.mxu1 %v3385_v15 }
 0x43d   :  { %2983 = vmatprep.subr.bf16.mxu0 %v3386_v16  ;;  %3005 = vmatprep.subr.bf16.mxu1 %v3387_v17 }
 0x440   :  { %2984 = vmatpush3.bf16.msra.mxu0 %v3388_v18  ;;  %3006 = vmatpush3.bf16.msra.mxu1 %v3389_v20 }
 0x4f6   :  { %v3880_v12 = vpop.f32.mrb[8].mxu0  ;;  %v3882_v9 = vpop.f32.mrb[8].mxu1 }
 0x4f7   :  { %v2123_v21 = vrot.slane %v3880_v12, 4  ;;  %v2151_v22 = vmul.f32 %v3880_v12, %v3880_v12  ;;  %v2135_v4 = vrot.slane %v3882_v9, 4  ;;  %v2153_v23 = vmul.f32 %v3882_v9, %v3882_v9  ;;  %v3890_v26 = vpop.f32.mrb[9].mxu0  ;;  %v3892_v48 = vpop.f32.mrb[9].mxu1 }
 0x4f8   :  { %v2129_v27 = vrot.slane %v3890_v26, 4  ;;  %v2152_v28 = vmul.f32 %v3890_v26, %v3890_v26  ;;  %v2141_v29 = vrot.slane %v3892_v48, 4  ;;  %v2154_v30 = vmul.f32 %v3892_v48, %v3892_v48  ;;  %v2038_v31 = vpop.f32.mrb[10].mxu0  ;;  %v2120_v32 = vpop.f32.mrb[10].mxu1 }
 0x4f9   :  { %v2124_v33 = vadd.f32 %v2123_v21, %v3880_v12  ;;  %v2155_v34 = vrot.slane %v2151_v22, 4  ;;  %v2136_v35 = vadd.f32 %v2135_v4, %v3882_v9  ;;  %v2167_v39 = vrot.slane %v2153_v23, 4  ;;  %v2039_v41 = vpop.f32.mrb[11].mxu0  ;;  %v2121_v45 = vpop.f32.mrb[11].mxu1 }
 0x4fa   :  { %v2130_v47 = vadd.f32 %v2129_v27, %v3890_v26  ;;  %v2161_v50 = vrot.slane %v2152_v28, 4  ;;  %v2142_v51 = vadd.f32 %v2141_v29, %v3892_v48  ;;  %v2173_v53 = vrot.slane %v2154_v30, 4 }
 0x4fb   :  { %v2125_v36 = vrot.slane %v2124_v33, 2  ;;  %v2156_v40 = vadd.f32 %v2155_v34, %v2151_v22  ;;  %v2137_v42 = vrot.slane %v2136_v35, 2  ;;  %v2168_v46 = vadd.f32 %v2167_v39, %v2153_v23 }
 0x4fc   :  { %v2131_v55 = vrot.slane %v2130_v47, 2  ;;  %v2162_v59 = vadd.f32 %v2161_v50, %v2152_v28  ;;  %v2143_v44 = vrot.slane %v2142_v51, 2  ;;  %v2174_v43 = vadd.f32 %v2173_v53, %v2154_v30 }
 0x4fd   :  { %v2126_v37 = vadd.f32 %v2125_v36, %v2124_v33  ;;  %v2157_v38 = vrot.slane %v2156_v40, 2  ;;  %v2138_v60 = vadd.f32 %v2137_v42, %v2136_v35  ;;  %v2169_v62 = vrot.slane %v2168_v46, 2 }
 0x4fe   :  { %v2132_v63 = vadd.f32 %v2131_v55, %v2130_v47  ;;  %v2163_v0 = vrot.slane %v2162_v59, 2  ;;  %v2144_v1 = vadd.f32 %v2143_v44, %v2142_v51  ;;  %v2175_v2 = vrot.slane %v2174_v43, 2 }
 0x4ff   :  { %v2127_v3 = vrot.slane %v2126_v37, 1  ;;  %v2158_v5 = vadd.f32 %v2157_v38, %v2156_v40  ;;  %v2139_v6 = vrot.slane %v2138_v60, 1  ;;  %v2170_v7 = vadd.f32 %v2169_v62, %v2168_v46 }
 0x500   :  { %v2133_v8 = vrot.slane %v2132_v63, 1  ;;  %v2164_v10 = vadd.f32 %v2163_v0, %v2162_v59  ;;  %v2145_v13 = vrot.slane %v2144_v1, 1  ;;  %v2176_v15 = vadd.f32 %v2175_v2, %v2174_v43  ;;  %v124_v0 = vld [vmem:[#allocation11 + $0x10] sm:$0x3f] }
 0x501   :  { %v2128_v16 = vadd.f32 %v2127_v3, %v2126_v37  ;;  %v2159_v17 = vrot.slane %v2158_v5, 1  ;;  %v2140_v18 = vadd.f32 %v2139_v6, %v2138_v60  ;;  %v2171_v20 = vrot.slane %v2170_v7, 1 }
 0x502   :  { %v2134_v21 = vadd.f32 %v2133_v8, %v2132_v63  ;;  %v2165_v22 = vrot.slane %v2164_v10, 1  ;;  %v2146_v4 = vadd.f32 %v2145_v13, %v2144_v1  ;;  %v2177_v23 = vrot.slane %v2176_v15, 1 }
 0x503   :  { %v2147_v27 = vmul.f32 0.125, %v2128_v16  ;;  %v2160_v28 = vadd.f32 %v2159_v17, %v2158_v5  ;;  %v2149_v29 = vmul.f32 0.125, %v2140_v18  ;;  %v2172_v30 = vadd.f32 %v2171_v20, %v2170_v7 }
 0x504   :  { %v2148_v31 = vmul.f32 0.125, %v2134_v21  ;;  %v2166_v32 = vadd.f32 %v2165_v22, %v2164_v10  ;;  %v2150_v33 = vmul.f32 0.125, %v2146_v4  ;;  %v2178_v34 = vadd.f32 %v2177_v23, %v2176_v15 }
 0x505   :  { %v2179_v35 = vmul.f32 0.125, %v2160_v28  ;;  %v2183_v39 = vmul.f32 %v2147_v27, %v2147_v27  ;;  %v2181_v41 = vmul.f32 0.125, %v2172_v30  ;;  %v2185_v45 = vmul.f32 %v2149_v29, %v2149_v29 }
 0x506   :  { %v2180_v47 = vmul.f32 0.125, %v2166_v32  ;;  %v2184_v50 = vmul.f32 %v2148_v31, %v2148_v31  ;;  %v2182_v51 = vmul.f32 0.125, %v2178_v34  ;;  %v2186_v53 = vmul.f32 %v2150_v33, %v2150_v33 }
 0x507   :  { %v2187_v36 = vsub.f32 %v2179_v35, %v2183_v39  ;;  %v2189_v40 = vsub.f32 %v2181_v41, %v2185_v45  ;;  %v2204_v5 = vrot.slane %v124_v0, 6 }
 0x508   :  { %v2188_v42 = vsub.f32 %v2180_v47, %v2184_v50  ;;  %v2190_v46 = vsub.f32 %v2182_v51, %v2186_v53 }
 0x509   :  { %v2191_v55 = vmax.f32 %v2187_v36, 0.0  ;;  %v2193_v59 = vmax.f32 %v2189_v40, 0.0  ;;  %v2205_v13 = vsel %vm1035_vm2, %v1034_v19, %v2204_v5 }
 0x50a   :  { %v2192_v44 = vmax.f32 %v2188_v42, 0.0  ;;  %v2194_v43 = vmax.f32 %v2190_v46, 0.0 }
 0x50b   :  { %v2195_v37 = vadd.f32 1e-05, %v2191_v55  ;;  %v2197_v38 = vadd.f32 1e-05, %v2193_v59 }
 0x50c   :  { %v2196_v60 = vadd.f32 1e-05, %v2192_v44  ;;  %v2198_v62 = vadd.f32 1e-05, %v2194_v43 }
 0x50d   :  { %3418 = vrsqrt.f32 %v2195_v37 }
 0x50e   :  { %3420 = vrsqrt.f32 %v2197_v38 }
 0x50f   :  { %3422 = vrsqrt.f32 %v2196_v60 }
 0x510   :  { %3424 = vrsqrt.f32 %v2198_v62 }
 0x517   :  { %v3419_v63 = vpop.eup %3418 }
 0x518   :  { %v3421_v1 = vpop.eup %3420 }
 0x519   :  { %v3423_v2 = vpop.eup %3422 }
 0x51a   :  { %v3425_v3 = vpop.eup %3424  ;;  %v2211_v6 = vcombine.low %v3419_v63, %v3423_v2 }
 0x51b   :  { %v2212_v7 = vcombine.low %v3421_v1, %v3425_v3 }
 0x51c   :  { %v2219_v8 = vrot.slane %v2211_v6, %v3785_v52  ;;  %v2934_v6 = vld [vmem:[%s3957_s7] ss:$0 sm:$0xff] }
 0x51d   :  { %v2226_v10 = vrot.slane %v2212_v7, %v3785_v52 }
 0x51f   :  { %v2227_v15 = vcombine.low %v2219_v8, %v2226_v10 }
 0x521   :  { %v2229_v16 = vmul.f32 %v2227_v15, %v2205_v13 }
 0x523   :  { %v2234_v17 = vrot.slane %v2229_v16, %v3788_v54  ;;  %v2238_v18 = vrot.slane %v2229_v16, %v3800_v61  ;;  %v2242_v20 = vrot.slane %v2229_v16, %v1072_v24  ;;  %v2246_v21 = vrot.slane %v2229_v16, %v1076_v25 }
 0x525   :  { %v2251_v22 = vmul.f32 %v2234_v17, %v2147_v27  ;;  %v2252_v4 = vmul.f32 %v2238_v18, %v2148_v31  ;;  %v2253_v23 = vmul.f32 %v2242_v20, %v2149_v29  ;;  %v2254_v28 = vmul.f32 %v2246_v21, %v2150_v33 }
 0x526   :  { %v2294_v14 = vrot.slane %v2246_v21, %v3788_v54  ;;  %v2286_v19 = vrot.slane %v2238_v18, %v3788_v54  ;;  %v2282_v30 = vrot.slane %v2234_v17, %v3788_v54  ;;  %v2290_v32 = vrot.slane %v2242_v20, %v3788_v54 }
 0x527   :  { %v2259_v34 = vcombine.low %v2251_v22, %v2252_v4  ;;  %v2260_v61 = vcombine.low %v2253_v23, %v2254_v28 }
 0x528   :  { %v2298_v35 = vmul.f32 %v2294_v14, %v3892_v48  ;;  %v2296_v24 = vmul.f32 %v2286_v19, %v3890_v26  ;;  %v2295_v25 = vmul.f32 %v2282_v30, %v3880_v12  ;;  %v2297_v27 = vmul.f32 %v2290_v32, %v3882_v9 }
 0x529   :  { %v2267_v29 = vrot.slane %v2259_v34, %v3785_v52  ;;  %v2274_v31 = vrot.slane %v2260_v61, %v3785_v52 }
 0x52b   :  { %v2275_v33 = vcombine.low %v2267_v29, %v2274_v31 }
 0x52d   :  { %v2276_v39 = vrot.slane %v2275_v33, 7 }
 0x52f   :  { %v2278_v41 = vsub.f32 %v2205_v13, %v2276_v39 }
 0x531   :  { %v2315_v54 = vrot.slane %v2278_v41, %v1145_v56  ;;  %v2307_v45 = vrot.slane %v2278_v41, %v3808_v11  ;;  %v2303_v48 = vrot.slane %v2278_v41, %v3793_v58  ;;  %v2311_v26 = vrot.slane %v2278_v41, %v1141_v57 }
 0x533   :  { %v2335_v12 = vrot.slane %v2315_v54, %v3793_v58  ;;  %v2327_v9 = vrot.slane %v2307_v45, %v3793_v58  ;;  %v2323_v47 = vrot.slane %v2303_v48, %v3793_v58  ;;  %v2331_v52 = vrot.slane %v2311_v26, %v3793_v58 }
 0x535   :  { %v2339_v50 = vadd.f32 %v2335_v12, %v2298_v35  ;;  %v2337_v51 = vadd.f32 %v2327_v9, %v2296_v24  ;;  %v2336_v53 = vadd.f32 %v2323_v47, %v2295_v25  ;;  %v2338_v36 = vadd.f32 %v2331_v52, %v2297_v27 }
 0x537   :  { %v2341_v56 = vmul.f32 0.5, %v2337_v51  ;;  %v2343_v40 = vmul.f32 0.5, %v2339_v50  ;;  %v2340_v11 = vmul.f32 0.5, %v2336_v53  ;;  %v2342_v42 = vmul.f32 0.5, %v2338_v36 }
 0x539   :  { %3426 = vtanh.f32 %v2341_v56 }
 0x53a   :  { %3428 = vtanh.f32 %v2343_v40 }
 0x53b   :  { %3430 = vtanh.f32 %v2340_v11 }
 0x53c   :  { %3432 = vtanh.f32 %v2342_v42 }
 0x543   :  { %v3427_v49 = vpop.eup %3426 }
 0x544   :  { %v3429_v57 = vpop.eup %3428  ;;  %v2349_v46 = vmul.f32 0.5, %v3427_v49 }
 0x545   :  { %v3431_v55 = vpop.eup %3430  ;;  %v2351_v59 = vmul.f32 0.5, %v3429_v57 }
 0x546   :  { %v3433_v44 = vpop.eup %3432  ;;  %v2353_v43 = vadd.f32 0.5, %v2349_v46  ;;  %v2348_v58 = vmul.f32 0.5, %v3431_v55 }
 0x547   :  { %v2355_v37 = vadd.f32 0.5, %v2351_v59  ;;  %v2350_v38 = vmul.f32 0.5, %v3433_v44 }
 0x548   :  { %v2357_v60 = vpack.c.bf16 %v2353_v43, %v2353_v43  ;;  %v2352_v62 = vadd.f32 0.5, %v2348_v58 }
 0x549   :  { %v2359_v63 = vpack.c.bf16 %v2355_v37, %v2355_v37  ;;  %v2354_v0 = vadd.f32 0.5, %v2350_v38 }
 0x54a   :  { %2655 = vmatprep.mubr.bf16.mxu0 %v2357_v60  ;;  %v2356_v1 = vpack.c.bf16 %v2352_v62, %v2352_v62 }
 0x54b   :  { %2695 = vmatprep.mubr.bf16.mxu1 %v2359_v63  ;;  %v2358_v2 = vpack.c.bf16 %v2354_v0, %v2354_v0 }
 0x54c   :  { %2656 = vmatmul.mubr.bf16.vlgmr.msra.gmra.mrb[12].mxu0 %v2356_v1 }
 0x54d   :  { %2696 = vmatmul.mubr.bf16.vlgmr.msra.gmra.mrb[12].mxu1 %v2358_v2 }
 0x61f   :  { %v2985_v3 = vpop.f32.mrb[12].mxu0 }
 0x620   :  { %v3007_v5 = vpop.f32.mrb[12].mxu1  ;;  %v2986_v7 = vpop.f32.mrb[13].mxu0 }
 0x621   :  { %v2987_v8 = vadd.f32 %v2986_v7, %v2985_v3  ;;  %v3008_v10 = vpop.f32.mrb[13].mxu1  ;;  %v2988_v13 = vpop.f32.mrb[14].mxu0 }
 0x622   :  { %v3009_v15 = vadd.f32 %v3008_v10, %v3007_v5  ;;  %v3010_v16 = vpop.f32.mrb[14].mxu1  ;;  %v2989_v17 = vpop.f32.mrb[15].mxu0 }
 0x623   :  { %v2658_v18 = vadd.f32 %v2987_v8, %v2934_v6  ;;  %v3011_v20 = vpop.f32.mrb[15].mxu1 }
 0x625   :  { %v2698_v21 = vadd.f32 %v3009_v15, %v2658_v18 }
 0x627   :  { %v2703_v22 = vmax.f32 %v2698_v21, 0.0 }
 0x629   :  { %2705 = vst.msk [vmem:[#allocation14] sm:$0xff] %vm2704_vm3, %v2703_v22 }
 0x62a   :  { %3599 = shalt.err (!%p3596_p4)
}
 0x62b   :  { %s3600_s29 = scalar_lea.hbm %s3958_s8, 128 }
 0x62c   :  { %p3601_p5 = scmp.ne.s32.totalorder %s3958_s8, %s3600_s29  ;;  %p3604_p6 = scmp.lt.u32.totalorder %s3600_s29, %s3958_s8 }
 0x62e   :  { %p3606_p7 = pnand %p3604_p6, %p3601_p5 }
 0x630   :  { %3609 = shalt.err (!%p3606_p7)
}
 0x631   :  { %2715 = dma.vmem_to_hbm [thread:$0]  %s2713_s28, 128, %s3958_s8, [#allocation4]  }
 0x632   :  { %3618 = dma.done.wait [#allocation4], 128  }
 0x633   :  { %3619 = vsyncadd [#allocation4], 4294967168 }
 0x634   :  { %2719 = vsyncpa [#allocation3], 1 }
 0x635   :  { %2720 = vsyncpa [#allocation6], 1 }
 0x636   :  { %2721 = vsyncpa [#allocation9], 1 }
 0x637   :  { %2722 = vsyncpa [#allocation12], 1 }
 0x638   :  { %2723 = vsyncpa [#allocation4], 1 }

</bundles_post_ra>
